<compile_context>
chip_gen: v6e
topology: v6e:2x2x1
jax: 0.10.0
libtpu: 0.0.40
codegen_flags: <defaults>
</compile_context>

<pallas_src>
import jax
import jax.numpy as jnp
from jax.experimental import pallas as pl
from jax.experimental.pallas import tpu as pltpu

LATENT_DIM = 20
IN_DIM = 784            # 784 = 6*128 + 16 -> kept unpadded (full last-dim blocks)
HID_DIM = 400

HID_PAD = 512           # 400 -> 4 * 128
LAT_PAD = 128           # 20  -> 128
HEAD_PAD = 2 * LAT_PAD  # fused [mu | logvar] head (lane-dense, 256)


def _round_up(x, m):
    return (x + m - 1) // m * m


# --------------------------------------------------------------------------
# Kernel
# --------------------------------------------------------------------------
def _vae_kernel(
    x_ref, eps_ref,
    w1_ref, b1_ref,
    wh_ref, bh_ref,
    w3_ref, b3_ref,
    w4_ref, b4_ref,
    recon_ref, mulv_ref,
):
    # Matmuls: bf16 operands, f32 accumulation on the MXU.
    # Element-wise math stays f32 (v5e has no bf16 VPU/EUP).
    x = x_ref[...].astype(jnp.bfloat16)                               # (TB, 784)

    # fc1 + relu
    h1 = jnp.dot(x, w1_ref[...], preferred_element_type=jnp.float32) + b1_ref[...]
    h1 = jnp.maximum(h1, 0.0)                                         # (TB, 512)

    # fc21 / fc22 fused into one lane-dense head matmul: [mu | logvar]
    mulv = jnp.dot(h1.astype(jnp.bfloat16), wh_ref[...],
                   preferred_element_type=jnp.float32) + bh_ref[...]  # (TB, 256)

    # Store mulv immediately: frees its vregs for the decode path and lets the
    # writeback DMA overlap with fc3/fc4.
    mulv_ref[...] = mulv

    mu = mulv[:, :LAT_PAD]
    logvar = mulv[:, LAT_PAD:]

    # reparameterize: z = mu + eps * exp(0.5 * logvar)
    # (padded mu/logvar lanes are exactly 0; padded eps lanes are 0 -> z pad = 0)
    z = mu + eps_ref[...] * jnp.exp(0.5 * logvar)                     # (TB, 128)

    # decode: fc3 + relu, fc4
    h3 = jnp.dot(z.astype(jnp.bfloat16), w3_ref[...],
                 preferred_element_type=jnp.float32) + b3_ref[...]
    h3 = jnp.maximum(h3, 0.0)                                         # (TB, 512)
    logits = jnp.dot(h3.astype(jnp.bfloat16), w4_ref[...],
                     preferred_element_type=jnp.float32) + b4_ref[...]  # (TB, 784)

    # sigmoid(x) = 0.5 * tanh(0.5 * x) + 0.5  (single EUP op per vreg)
    recon = 0.5 * jnp.tanh(0.5 * logits) + 0.5
    recon_ref[...] = recon.astype(recon_ref.dtype)                    # bf16 store


# --------------------------------------------------------------------------
# Parameter preparation (done once): zero-pad hidden/latent dims to lane
# multiples, cast weights to bf16, fuse the mu/logvar heads.  Zero rows/cols
# guarantee padded lanes stay exactly zero through the network.
# --------------------------------------------------------------------------
def prepare_params(params):
    (w1, b1), (w21, b21), (w22, b22), (w3, b3), (w4, b4) = params

    # fc1: (784, 400) -> (784, 512)
    w1p = (jnp.zeros((IN_DIM, HID_PAD), jnp.float32)
           .at[:, :HID_DIM].set(w1).astype(jnp.bfloat16))
    b1p = jnp.zeros((1, HID_PAD), jnp.float32).at[:, :HID_DIM].set(b1)

    # fused head [mu | logvar]: (512, 256)
    wh = jnp.zeros((HID_PAD, HEAD_PAD), jnp.float32)
    wh = wh.at[:HID_DIM, :LATENT_DIM].set(w21)
    wh = wh.at[:HID_DIM, LAT_PAD:LAT_PAD + LATENT_DIM].set(w22)
    whp = wh.astype(jnp.bfloat16)
    bh = jnp.zeros((1, HEAD_PAD), jnp.float32)
    bh = bh.at[:, :LATENT_DIM].set(b21)
    bh = bh.at[:, LAT_PAD:LAT_PAD + LATENT_DIM].set(b22)

    # fc3: (20, 400) -> (128, 512); zero rows annihilate padded z lanes
    w3p = (jnp.zeros((LAT_PAD, HID_PAD), jnp.float32)
           .at[:LATENT_DIM, :HID_DIM].set(w3).astype(jnp.bfloat16))
    b3p = jnp.zeros((1, HID_PAD), jnp.float32).at[:, :HID_DIM].set(b3)

    # fc4: (400, 784) -> (512, 784); output lanes kept at 784 (dense recon store)
    w4p = (jnp.zeros((HID_PAD, IN_DIM), jnp.float32)
           .at[:HID_DIM, :].set(w4).astype(jnp.bfloat16))
    b4p = b4.astype(jnp.float32)                                      # (1, 784)

    return (w1p, b1p, whp, bh, w3p, b3p, w4p, b4p)


# --------------------------------------------------------------------------
# Forward wrapper
# --------------------------------------------------------------------------
@jax.jit
def vae_forward(x_nchw, eps, padded_params):
    """Fused VAE forward. x_nchw: (B, 1, 28, 28). eps: (B, latent)."""
    batch = x_nchw.shape[0]
    x = x_nchw.reshape(-1, IN_DIM).astype(jnp.float32)   # x.view(-1, 784), no pad/cast pass

    # Tile plan: minimize batch padding, keep >= 2 grid steps for v7x megacore.
    n_tiles = -(-batch // 256)
    if batch >= 64:
        n_tiles = max(n_tiles, 2)
    tb = _round_up(-(-batch // n_tiles), 16)             # 16 = bf16 sublane pack
    b_pad = n_tiles * tb                                 # e.g. 300 -> 320 (2 x 160)

    if b_pad != batch:
        x = jnp.pad(x, ((0, b_pad - batch), (0, 0)))     # cheap row-only pad

    # eps is tiny; build it lane-padded (zeros in padded lanes -> z pad stays 0).
    eps_p = jnp.zeros((b_pad, LAT_PAD), jnp.float32).at[:batch, :LATENT_DIM].set(
        eps.astype(jnp.float32))

    w1p, b1p, whp, bhp, w3p, b3p, w4p, b4p = padded_params

    def batch_spec(cols):
        return pl.BlockSpec((tb, cols), lambda i: (i, 0))

    def const_spec(a):
        # Weights / biases: same block at every grid step -> fetched once,
        # VMEM-resident while batch tiles pipeline.
        return pl.BlockSpec(a.shape, lambda i: (0, 0))

    recon_p, mulv_p = pl.pallas_call(
        _vae_kernel,
        grid=(n_tiles,),
        out_shape=(
            jax.ShapeDtypeStruct((b_pad, IN_DIM), jnp.bfloat16),   # recon (dense 784, bf16)
            jax.ShapeDtypeStruct((b_pad, HEAD_PAD), jnp.float32),  # [mu | logvar]
        ),
        in_specs=[
            batch_spec(IN_DIM),        # x (f32, cast to bf16 in kernel)
            batch_spec(LAT_PAD),       # eps
            const_spec(w1p), const_spec(b1p),
            const_spec(whp), const_spec(bhp),
            const_spec(w3p), const_spec(b3p),
            const_spec(w4p), const_spec(b4p),
        ],
        out_specs=(
            pl.BlockSpec((tb, IN_DIM), lambda i: (i, 0)),
            pl.BlockSpec((tb, HEAD_PAD), lambda i: (i, 0)),
        ),
        compiler_params=pltpu.CompilerParams(
            dimension_semantics=("parallel",),     # v7x: shard batch tiles over 2 TCs
            vmem_limit_bytes=24 << 20,
        ),
    )(x, eps_p, w1p, b1p, whp, bhp, w3p, b3p, w4p, b4p)

    recon = recon_p[:batch]                                # lane dim already 784
    mu = mulv_p[:batch, :LATENT_DIM]
    logvar = mulv_p[:batch, LAT_PAD:LAT_PAD + LATENT_DIM]
    return recon, mu, logvar


# --------------------------------------------------------------------------
# Params / references
# --------------------------------------------------------------------------
def init_params(key, latent_dim=LATENT_DIM):
    """Deterministic synthetic params. Weights stored as (in, out), f32."""
    def linear(k, fan_in, fan_out):
        kw, kb = jax.random.split(k)
        scale = 1.0 / jnp.sqrt(jnp.float32(fan_in))
        w = jax.random.uniform(kw, (fan_in, fan_out), jnp.float32, -scale, scale)
        b = jax.random.uniform(kb, (1, fan_out), jnp.float32, -scale, scale)
        return w, b

    k1, k21, k22, k3, k4 = jax.random.split(key, 5)
    return (
        linear(k1, IN_DIM, HID_DIM),        # fc1
        linear(k21, HID_DIM, latent_dim),   # fc21
        linear(k22, HID_DIM, latent_dim),   # fc22
        linear(k3, latent_dim, HID_DIM),    # fc3
        linear(k4, HID_DIM, IN_DIM),        # fc4
    )


def vae_forward_ref_f32(x_nchw, eps, params):
    """Pure-f32 JAX reference (module semantics)."""
    x = x_nchw.reshape(-1, IN_DIM).astype(jnp.float32)
    (w1, b1), (w21, b21), (w22, b22), (w3, b3), (w4, b4) = params
    h1 = jnp.maximum(x @ w1 + b1, 0.0)
    mu = h1 @ w21 + b21
    logvar = h1 @ w22 + b22
    z = mu + eps * jnp.exp(0.5 * logvar)
    h3 = jnp.maximum(z @ w3 + b3, 0.0)
    recon = jax.nn.sigmoid(h3 @ w4 + b4)
    return recon, mu, logvar


def vae_forward_ref_bf16(x_nchw, eps, params):
    """Reference matching the kernel's bf16-matmul / f32-accumulate recipe."""
    x = x_nchw.reshape(-1, IN_DIM).astype(jnp.bfloat16)
    (w1, b1), (w21, b21), (w22, b22), (w3, b3), (w4, b4) = params
    bf = lambda a: a.astype(jnp.bfloat16)
    dot = lambda a, b: jnp.dot(bf(a), bf(b), preferred_element_type=jnp.float32)
    h1 = jnp.maximum(jnp.dot(x, bf(w1), preferred_element_type=jnp.float32) + b1, 0.0)
    mu = dot(h1, w21) + b21
    logvar = dot(h1, w22) + b22
    z = mu + eps * jnp.exp(0.5 * logvar)
    h3 = jnp.maximum(dot(z, w3) + b3, 0.0)
    recon = jax.nn.sigmoid(dot(h3, w4) + b4)
    return recon, mu, logvar


if __name__ == "__main__":
    key = jax.random.PRNGKey(0)
    k_param, k_data = jax.random.split(key)

    params = init_params(k_param)
    padded_params = prepare_params(params)

    # batch=8: single grid step (tb=16).  batch=300: 2 tiles of 160 (padded to 320).
    for batch in (8, 300):
        kx, ke = jax.random.split(jax.random.fold_in(k_data, batch))
        x = jax.random.uniform(kx, (batch, 1, 28, 28), jnp.float32)   # NCHW input
        # torch.randn_like(std) is stochastic; we pass deterministic eps explicitly.
        eps = jax.random.normal(ke, (batch, LATENT_DIM), jnp.float32)

        recon, mu, logvar = vae_forward(x, eps, padded_params)
        jax.block_until_ready((recon, mu, logvar))

        assert recon.shape == (batch, IN_DIM)
        assert mu.shape == (batch, LATENT_DIM) and logvar.shape == (batch, LATENT_DIM)

        # Check against the identically-quantized (bf16-matmul) reference.
        # recon is stored in bf16 (and uses the tanh sigmoid identity), so its
        # tolerance is slightly looser than mu/logvar (kept f32).
        r_b, m_b, lv_b = vae_forward_ref_bf16(x, eps, params)
        recon_f32 = recon.astype(jnp.float32)
        assert jnp.allclose(recon_f32, r_b, atol=8e-3), float(jnp.max(jnp.abs(recon_f32 - r_b)))
        assert jnp.allclose(mu, m_b, atol=3e-3), float(jnp.max(jnp.abs(mu - m_b)))
        assert jnp.allclose(logvar, lv_b, atol=3e-3), float(jnp.max(jnp.abs(logvar - lv_b)))

        # Loose sanity check against the pure-f32 module semantics.
        r_f, m_f, lv_f = vae_forward_ref_f32(x, eps, params)
        assert float(jnp.max(jnp.abs(recon_f32 - r_f))) < 0.05
        assert float(jnp.max(jnp.abs(mu - m_f))) < 0.05
        assert float(jnp.max(jnp.abs(logvar - lv_f))) < 0.05

    print("KERNEL_OK")
</pallas_src>

<mosaic_0001>
module attributes {stable_mosaic.version = 11 : i64} {
  func.func @_vae_kernel(%arg0: i32, %arg1: memref<16x784xf32, #tpu.memory_space<vmem>>, %arg2: memref<16x128xf32, #tpu.memory_space<vmem>>, %arg3: memref<784x512xbf16, #tpu.memory_space<vmem>>, %arg4: memref<1x512xf32, #tpu.memory_space<vmem>>, %arg5: memref<512x256xbf16, #tpu.memory_space<vmem>>, %arg6: memref<1x256xf32, #tpu.memory_space<vmem>>, %arg7: memref<128x512xbf16, #tpu.memory_space<vmem>>, %arg8: memref<1x512xf32, #tpu.memory_space<vmem>>, %arg9: memref<512x784xbf16, #tpu.memory_space<vmem>>, %arg10: memref<1x784xf32, #tpu.memory_space<vmem>>, %arg11: memref<16x784xbf16, #tpu.memory_space<vmem>>, %arg12: memref<16x256xf32, #tpu.memory_space<vmem>>) attributes {dimension_semantics = [#tpu.dimension_semantics<parallel>], iteration_bounds = array<i64: 1>, scalar_prefetch = 0 : i64, scratch_operands = 0 : i64, tpu.core_type = #tpu.core_type<tc>, window_params = [{transform_indices = @transform_0, window_bounds = array<i64: 16, 784>}, {transform_indices = @transform_1, window_bounds = array<i64: 16, 128>}, {pipeline_mode = #tpu.pipeline_mode<synchronous>, transform_indices = @transform_2, window_bounds = array<i64: 784, 512>}, {pipeline_mode = #tpu.pipeline_mode<synchronous>, transform_indices = @transform_3, window_bounds = array<i64: 1, 512>}, {pipeline_mode = #tpu.pipeline_mode<synchronous>, transform_indices = @transform_4, window_bounds = array<i64: 512, 256>}, {pipeline_mode = #tpu.pipeline_mode<synchronous>, transform_indices = @transform_5, window_bounds = array<i64: 1, 256>}, {pipeline_mode = #tpu.pipeline_mode<synchronous>, transform_indices = @transform_6, window_bounds = array<i64: 128, 512>}, {pipeline_mode = #tpu.pipeline_mode<synchronous>, transform_indices = @transform_7, window_bounds = array<i64: 1, 512>}, {pipeline_mode = #tpu.pipeline_mode<synchronous>, transform_indices = @transform_8, window_bounds = array<i64: 512, 784>}, {pipeline_mode = #tpu.pipeline_mode<synchronous>, transform_indices = @transform_9, window_bounds = array<i64: 1, 784>}, {transform_indices = @transform_10, window_bounds = array<i64: 16, 784>}, {transform_indices = @transform_11, window_bounds = array<i64: 16, 256>}]} {
    %c0 = arith.constant 0 : index
    %c0_0 = arith.constant 0 : index
    %0 = vector.load %arg1[%c0, %c0_0] : memref<16x784xf32, #tpu.memory_space<vmem>>, vector<16x784xf32>
    %1 = arith.truncf %0 : vector<16x784xf32> to vector<16x784xbf16>
    %c0_1 = arith.constant 0 : index
    %c0_2 = arith.constant 0 : index
    %2 = vector.load %arg3[%c0_1, %c0_2] : memref<784x512xbf16, #tpu.memory_space<vmem>>, vector<784x512xbf16>
    %cst = arith.constant dense<0.000000e+00> : vector<16x512xf32>
    %3 = tpu.matmul %1, %2, %cst {dimension_numbers = #tpu.dot_dimension_numbers<[1], [0], [0], [1], [0, 0, 1, 1], [], []>} : vector<16x784xbf16>, vector<784x512xbf16>, vector<16x512xf32> -> vector<16x512xf32>
    %c0_3 = arith.constant 0 : index
    %c0_4 = arith.constant 0 : index
    %4 = vector.load %arg4[%c0_3, %c0_4] : memref<1x512xf32, #tpu.memory_space<vmem>>, vector<1x512xf32>
    %5 = vector.broadcast %4 : vector<1x512xf32> to vector<16x512xf32>
    %6 = arith.addf %3, %5 : vector<16x512xf32>
    %cst_5 = arith.constant 0.000000e+00 : f32
    %7 = vector.broadcast %cst_5 : f32 to vector<16x512xf32>
    %8 = arith.maximumf %6, %7 : vector<16x512xf32>
    %9 = arith.truncf %8 : vector<16x512xf32> to vector<16x512xbf16>
    %c0_6 = arith.constant 0 : index
    %c0_7 = arith.constant 0 : index
    %10 = vector.load %arg5[%c0_6, %c0_7] : memref<512x256xbf16, #tpu.memory_space<vmem>>, vector<512x256xbf16>
    %cst_8 = arith.constant dense<0.000000e+00> : vector<16x256xf32>
    %11 = tpu.matmul %9, %10, %cst_8 {dimension_numbers = #tpu.dot_dimension_numbers<[1], [0], [0], [1], [0, 0, 1, 1], [], []>} : vector<16x512xbf16>, vector<512x256xbf16>, vector<16x256xf32> -> vector<16x256xf32>
    %c0_9 = arith.constant 0 : index
    %c0_10 = arith.constant 0 : index
    %12 = vector.load %arg6[%c0_9, %c0_10] : memref<1x256xf32, #tpu.memory_space<vmem>>, vector<1x256xf32>
    %13 = vector.broadcast %12 : vector<1x256xf32> to vector<16x256xf32>
    %14 = arith.addf %11, %13 : vector<16x256xf32>
    %c0_11 = arith.constant 0 : index
    %c0_12 = arith.constant 0 : index
    %15 = vector.load %arg12[%c0_11, %c0_12] : memref<16x256xf32, #tpu.memory_space<vmem>>, vector<16x256xf32>
    tpu.vector_store %arg12[%c0_11, %c0_12], %14 {strides = array<i32>} : memref<16x256xf32, #tpu.memory_space<vmem>>, vector<16x256xf32>,
    %16 = vector.extract_strided_slice %14 {offsets = [0, 0], sizes = [16, 128], strides = [1, 1]} : vector<16x256xf32> to vector<16x128xf32>
    %17 = vector.extract_strided_slice %14 {offsets = [0, 128], sizes = [16, 128], strides = [1, 1]} : vector<16x256xf32> to vector<16x128xf32>
    %c0_13 = arith.constant 0 : index
    %c0_14 = arith.constant 0 : index
    %18 = vector.load %arg2[%c0_13, %c0_14] : memref<16x128xf32, #tpu.memory_space<vmem>>, vector<16x128xf32>
    %cst_15 = arith.constant 5.000000e-01 : f32
    %19 = vector.broadcast %cst_15 : f32 to vector<16x128xf32>
    %20 = arith.mulf %19, %17 : vector<16x128xf32>
    %21 = math.exp %20 : vector<16x128xf32>
    %22 = arith.mulf %18, %21 : vector<16x128xf32>
    %23 = arith.addf %16, %22 : vector<16x128xf32>
    %24 = arith.truncf %23 : vector<16x128xf32> to vector<16x128xbf16>
    %c0_16 = arith.constant 0 : index
    %c0_17 = arith.constant 0 : index
    %25 = vector.load %arg7[%c0_16, %c0_17] : memref<128x512xbf16, #tpu.memory_space<vmem>>, vector<128x512xbf16>
    %cst_18 = arith.constant dense<0.000000e+00> : vector<16x512xf32>
    %26 = tpu.matmul %24, %25, %cst_18 {dimension_numbers = #tpu.dot_dimension_numbers<[1], [0], [0], [1], [0, 0, 1, 1], [], []>} : vector<16x128xbf16>, vector<128x512xbf16>, vector<16x512xf32> -> vector<16x512xf32>
    %c0_19 = arith.constant 0 : index
    %c0_20 = arith.constant 0 : index
    %27 = vector.load %arg8[%c0_19, %c0_20] : memref<1x512xf32, #tpu.memory_space<vmem>>, vector<1x512xf32>
    %28 = vector.broadcast %27 : vector<1x512xf32> to vector<16x512xf32>
    %29 = arith.addf %26, %28 : vector<16x512xf32>
    %cst_21 = arith.constant 0.000000e+00 : f32
    %30 = vector.broadcast %cst_21 : f32 to vector<16x512xf32>
    %31 = arith.maximumf %29, %30 : vector<16x512xf32>
    %32 = arith.truncf %31 : vector<16x512xf32> to vector<16x512xbf16>
    %c0_22 = arith.constant 0 : index
    %c0_23 = arith.constant 0 : index
    %33 = vector.load %arg9[%c0_22, %c0_23] : memref<512x784xbf16, #tpu.memory_space<vmem>>, vector<512x784xbf16>
    %cst_24 = arith.constant dense<0.000000e+00> : vector<16x784xf32>
    %34 = tpu.matmul %32, %33, %cst_24 {dimension_numbers = #tpu.dot_dimension_numbers<[1], [0], [0], [1], [0, 0, 1, 1], [], []>} : vector<16x512xbf16>, vector<512x784xbf16>, vector<16x784xf32> -> vector<16x784xf32>
    %c0_25 = arith.constant 0 : index
    %c0_26 = arith.constant 0 : index
    %35 = vector.load %arg10[%c0_25, %c0_26] : memref<1x784xf32, #tpu.memory_space<vmem>>, vector<1x784xf32>
    %36 = vector.broadcast %35 : vector<1x784xf32> to vector<16x784xf32>
    %37 = arith.addf %34, %36 : vector<16x784xf32>
    %cst_27 = arith.constant 5.000000e-01 : f32
    %38 = vector.broadcast %cst_27 : f32 to vector<16x784xf32>
    %39 = arith.mulf %38, %37 : vector<16x784xf32>
    %40 = math.tanh %39 : vector<16x784xf32>
    %cst_28 = arith.constant 5.000000e-01 : f32
    %41 = vector.broadcast %cst_28 : f32 to vector<16x784xf32>
    %42 = arith.mulf %41, %40 : vector<16x784xf32>
    %cst_29 = arith.constant 5.000000e-01 : f32
    %43 = vector.broadcast %cst_29 : f32 to vector<16x784xf32>
    %44 = arith.addf %42, %43 : vector<16x784xf32>
    %45 = arith.truncf %44 : vector<16x784xf32> to vector<16x784xbf16>
    %c0_30 = arith.constant 0 : index
    %c0_31 = arith.constant 0 : index
    %46 = vector.load %arg11[%c0_30, %c0_31] : memref<16x784xbf16, #tpu.memory_space<vmem>>, vector<16x784xbf16>
    tpu.vector_store %arg11[%c0_30, %c0_31], %45 {strides = array<i32>} : memref<16x784xbf16, #tpu.memory_space<vmem>>, vector<16x784xbf16>,
    return
  }
  func.func @transform_0(%arg0: i32) -> (i32, i32) {
    %c0_i32 = arith.constant 0 : i32
    %c0_i32_0 = arith.constant 0 : i32
    return %arg0, %c0_i32 : i32, i32
  }
  func.func @transform_1(%arg0: i32) -> (i32, i32) {
    %c0_i32 = arith.constant 0 : i32
    %c0_i32_0 = arith.constant 0 : i32
    return %arg0, %c0_i32 : i32, i32
  }
  func.func @transform_2(%arg0: i32) -> (i32, i32) {
    %c0_i32 = arith.constant 0 : i32
    %c0_i32_0 = arith.constant 0 : i32
    %c0_i32_1 = arith.constant 0 : i32
    return %c0_i32, %c0_i32_0 : i32, i32
  }
  func.func @transform_3(%arg0: i32) -> (i32, i32) {
    %c0_i32 = arith.constant 0 : i32
    %c0_i32_0 = arith.constant 0 : i32
    %c0_i32_1 = arith.constant 0 : i32
    return %c0_i32, %c0_i32_0 : i32, i32
  }
  func.func @transform_4(%arg0: i32) -> (i32, i32) {
    %c0_i32 = arith.constant 0 : i32
    %c0_i32_0 = arith.constant 0 : i32
    %c0_i32_1 = arith.constant 0 : i32
    return %c0_i32, %c0_i32_0 : i32, i32
  }
  func.func @transform_5(%arg0: i32) -> (i32, i32) {
    %c0_i32 = arith.constant 0 : i32
    %c0_i32_0 = arith.constant 0 : i32
    %c0_i32_1 = arith.constant 0 : i32
    return %c0_i32, %c0_i32_0 : i32, i32
  }
  func.func @transform_6(%arg0: i32) -> (i32, i32) {
    %c0_i32 = arith.constant 0 : i32
    %c0_i32_0 = arith.constant 0 : i32
    %c0_i32_1 = arith.constant 0 : i32
    return %c0_i32, %c0_i32_0 : i32, i32
  }
  func.func @transform_7(%arg0: i32) -> (i32, i32) {
    %c0_i32 = arith.constant 0 : i32
    %c0_i32_0 = arith.constant 0 : i32
    %c0_i32_1 = arith.constant 0 : i32
    return %c0_i32, %c0_i32_0 : i32, i32
  }
  func.func @transform_8(%arg0: i32) -> (i32, i32) {
    %c0_i32 = arith.constant 0 : i32
    %c0_i32_0 = arith.constant 0 : i32
    %c0_i32_1 = arith.constant 0 : i32
    return %c0_i32, %c0_i32_0 : i32, i32
  }
  func.func @transform_9(%arg0: i32) -> (i32, i32) {
    %c0_i32 = arith.constant 0 : i32
    %c0_i32_0 = arith.constant 0 : i32
    %c0_i32_1 = arith.constant 0 : i32
    return %c0_i32, %c0_i32_0 : i32, i32
  }
  func.func @transform_10(%arg0: i32) -> (i32, i32) {
    %c0_i32 = arith.constant 0 : i32
    %c0_i32_0 = arith.constant 0 : i32
    return %arg0, %c0_i32 : i32, i32
  }
  func.func @transform_11(%arg0: i32) -> (i32, i32) {
    %c0_i32 = arith.constant 0 : i32
    %c0_i32_0 = arith.constant 0 : i32
    return %arg0, %c0_i32 : i32, i32
  }
}

</mosaic_0001>

<bundles_post_ra>
// kernel: vae_forward.1
= control target key start
LH: loop header
LB: loop body
LE: loop exit
PB: predicated region body
PF: predicated region fallthrough
CT: control target
= control target key end

     0   :  { %vm1257_vm0 = vcmask 130048   ;;  %vm4316_vm1 = vcmask 125952   ;;  %s7502_s2 = inlined_call_operand.vmem [shape: bf16[784,512], index: 2, kind: input, shape index: {}]   ;;  %s7503_s0 = inlined_call_operand.vmem [shape: f32[16,784], index: 0, kind: input, shape index: {}]   ;;  %s7504_s4 = inlined_call_operand.vmem [shape: bf16[512,256], index: 4, kind: input, shape index: {}]   ;;  %s7505_s3 = inlined_call_operand.vmem [shape: f32[1,512], index: 3, kind: input, shape index: {}]   ;;  %s7506_s6 = inlined_call_operand.vmem [shape: bf16[128,512], index: 6, kind: input, shape index: {}]   ;;  %s7507_s8 = inlined_call_operand.vmem [shape: bf16[512,784], index: 8, kind: input, shape index: {}]   ;;  %s7508_s5 = inlined_call_operand.vmem [shape: f32[1,256], index: 5, kind: input, shape index: {}]   ;;  %s7509_s11 = inlined_call_operand.vmem [shape: f32[16,256], index: 11, kind: output, shape index: {1}]   ;;  %s7510_s1 = inlined_call_operand.vmem [shape: f32[16,128], index: 1, kind: input, shape index: {}]   ;;  %s7511_s7 = inlined_call_operand.vmem [shape: f32[1,512], index: 7, kind: input, shape index: {}]   ;;  %s7512_s9 = inlined_call_operand.vmem [shape: f32[1,784], index: 9, kind: input, shape index: {}]   ;;  %s7513_s10 = inlined_call_operand.vmem [shape: bf16[16,784], index: 10, kind: output, shape index: {0}]  }
   0x1   :  { %v4909_v0 = vld [vmem:[%s7502_s2 + $0xe4] ss:$16 sps:$4 sm:$0xff]   ;;  %v4913_v2 = vld [vmem:[%s7502_s2 + $0xe0] ss:$16 sps:$4 sm:$0xff]   ;;  %v39_v46 = vld [vmem:[%s7503_s0 + $0x8] sm:$0xff] }
   0x2   :  { %v4911_v1 = vld [vmem:[%s7502_s2 + $0x2e4] ss:$16 sps:$4 sm:$0xff]   ;;  %1261 = vmatprep.subr.bf16.mxu0 %v4909_v0  ;;  %v4914_v3 = vld [vmem:[%s7502_s2 + $0x2e0] ss:$16 sps:$4 sm:$0xff]   ;;  %v41_v48 = vld [vmem:[%s7503_s0 + $0x18] sm:$0xff] }
   0x3   :  { %1304 = vmatprep.subr.bf16.mxu1 %v4911_v1  ;;  %v4915_v4 = vld [vmem:[%s7502_s2 + $0xc4] ss:$16 sps:$4 sm:$0xff]   ;;  %1262 = vmatpush1.bf16.msra.mxu0 %v4913_v2  ;;  %v4919_v6 = vld [vmem:[%s7502_s2 + $0xc0] ss:$16 sps:$4 sm:$0xff]  }
   0x4   :  { %1305 = vmatpush1.bf16.msra.mxu1 %v4914_v3  ;;  %v4917_v5 = vld [vmem:[%s7502_s2 + $0x2c4] ss:$16 sps:$4 sm:$0xff]   ;;  %1263 = vmatprep.subr.bf16.mxu0 %v4915_v4  ;;  %v4920_v7 = vld [vmem:[%s7502_s2 + $0x2c0] ss:$16 sps:$4 sm:$0xff]  }
   0x5   :  { %1306 = vmatprep.subr.bf16.mxu1 %v4917_v5  ;;  %v4921_v8 = vld [vmem:[%s7502_s2 + $0xa4] ss:$16 sps:$4 sm:$0xff]   ;;  %v4925_v10 = vld [vmem:[%s7502_s2 + $0xa0] ss:$16 sps:$4 sm:$0xff]  }
   0x6   :  { %v4923_v9 = vld [vmem:[%s7502_s2 + $0x2a4] ss:$16 sps:$4 sm:$0xff]   ;;  %v4926_v11 = vld [vmem:[%s7502_s2 + $0x2a0] ss:$16 sps:$4 sm:$0xff]  }
   0x7   :  { %1264 = vmatpush1.bf16.msra.mxu0 %v4919_v6  ;;  %v4927_v12 = vld [vmem:[%s7502_s2 + $0x84] ss:$16 sps:$4 sm:$0xff]   ;;  %v4931_v14 = vld [vmem:[%s7502_s2 + $0x80] ss:$16 sps:$4 sm:$0xff]  }
   0x8   :  { %1307 = vmatpush1.bf16.msra.mxu1 %v4920_v7  ;;  %1265 = vmatprep.subr.bf16.mxu0 %v4921_v8  ;;  %v4929_v13 = vld [vmem:[%s7502_s2 + $0x284] ss:$16 sps:$4 sm:$0xff]   ;;  %v4932_v15 = vld [vmem:[%s7502_s2 + $0x280] ss:$16 sps:$4 sm:$0xff]   ;;  %v45_v7 = vld [vmem:[%s7503_s0 + $0x38] sm:$0xff] }
   0x9   :  { %1308 = vmatprep.subr.bf16.mxu1 %v4923_v9  ;;  %v4933_v16 = vld [vmem:[%s7502_s2 + $0x64] ss:$16 sps:$4 sm:$0xff]   ;;  %v4937_v18 = vld [vmem:[%s7502_s2 + $0x60] ss:$16 sps:$4 sm:$0xff]   ;;  %v47_v9 = vld [vmem:[%s7503_s0 + $0x48] sm:$0xff] }
   0xa   :  { %v4935_v17 = vld [vmem:[%s7502_s2 + $0x264] ss:$16 sps:$4 sm:$0xff]   ;;  %v4938_v19 = vld [vmem:[%s7502_s2 + $0x260] ss:$16 sps:$4 sm:$0xff]  }
   0xb   :  { %1266 = vmatpush1.bf16.msra.mxu0 %v4925_v10  ;;  %v4939_v20 = vld [vmem:[%s7502_s2 + $0x44] ss:$16 sps:$4 sm:$0xff]   ;;  %v4943_v22 = vld [vmem:[%s7502_s2 + $0x40] ss:$16 sps:$4 sm:$0xff]  }
   0xc   :  { %1309 = vmatpush1.bf16.msra.mxu1 %v4926_v11  ;;  %1267 = vmatprep.subr.bf16.mxu0 %v4927_v12  ;;  %v4941_v21 = vld [vmem:[%s7502_s2 + $0x244] ss:$16 sps:$4 sm:$0xff]   ;;  %v4944_v23 = vld [vmem:[%s7502_s2 + $0x240] ss:$16 sps:$4 sm:$0xff]  }
   0xd   :  { %1310 = vmatprep.subr.bf16.mxu1 %v4929_v13  ;;  %v4945_v24 = vld [vmem:[%s7502_s2 + $0x24] ss:$16 sps:$4 sm:$0xff]   ;;  %v4949_v26 = vld [vmem:[%s7502_s2 + $0x20] ss:$16 sps:$4 sm:$0xff]  }
   0xe   :  { %v4947_v25 = vld [vmem:[%s7502_s2 + $0x224] ss:$16 sps:$4 sm:$0xff]   ;;  %v4950_v27 = vld [vmem:[%s7502_s2 + $0x220] ss:$16 sps:$4 sm:$0xff]  }
   0xf   :  { %1268 = vmatpush1.bf16.msra.mxu0 %v4931_v14  ;;  %v4951_v28 = vld [vmem:[%s7502_s2 + $0x4] ss:$16 sps:$4 sm:$0xff]   ;;  %v4955_v30 = vld [vmem:[%s7502_s2] ss:$16 sps:$4 sm:$0xff]  }
  0x10   :  { %1311 = vmatpush1.bf16.msra.mxu1 %v4932_v15  ;;  %1269 = vmatprep.subr.bf16.mxu0 %v4933_v16  ;;  %v4953_v29 = vld [vmem:[%s7502_s2 + $0x204] ss:$16 sps:$4 sm:$0xff]   ;;  %v4956_v31 = vld [vmem:[%s7502_s2 + $0x200] ss:$16 sps:$4 sm:$0xff]  }
  0x11   :  { %1312 = vmatprep.subr.bf16.mxu1 %v4935_v17  ;;  %v4957_v32 = vld [vmem:[%s7502_s2 + $0x1e4] ss:$16 sps:$4 sm:$0xff]   ;;  %v4961_v34 = vld [vmem:[%s7502_s2 + $0x1e0] ss:$16 sps:$4 sm:$0xff]   ;;  %v5016_v17 = vld [vmem:[%s7502_s2 + $0xec] ss:$16 sps:$4 sm:$0xff]  }
  0x12   :  { %v4959_v33 = vld [vmem:[%s7502_s2 + $0x3e4] ss:$16 sps:$4 sm:$0xff]   ;;  %v4962_v35 = vld [vmem:[%s7502_s2 + $0x3e0] ss:$16 sps:$4 sm:$0xff]  }
  0x13   :  { %1270 = vmatpush1.bf16.msra.mxu0 %v4937_v18  ;;  %v4963_v36 = vld [vmem:[%s7502_s2 + $0x1c4] ss:$16 sps:$4 sm:$0xff]   ;;  %v4967_v38 = vld [vmem:[%s7502_s2 + $0x1c0] ss:$16 sps:$4 sm:$0xff]  }
  0x14   :  { %1313 = vmatpush1.bf16.msra.mxu1 %v4938_v19  ;;  %1271 = vmatprep.subr.bf16.mxu0 %v4939_v20  ;;  %v4965_v37 = vld [vmem:[%s7502_s2 + $0x3c4] ss:$16 sps:$4 sm:$0xff]   ;;  %v4968_v39 = vld [vmem:[%s7502_s2 + $0x3c0] ss:$16 sps:$4 sm:$0xff]   ;;  %v51_v20 = vld [vmem:[%s7503_s0 + $0x68] sm:$0xff] }
  0x15   :  { %1314 = vmatprep.subr.bf16.mxu1 %v4941_v21  ;;  %v4969_v40 = vld [vmem:[%s7502_s2 + $0x1a4] ss:$16 sps:$4 sm:$0xff]   ;;  %v4973_v42 = vld [vmem:[%s7502_s2 + $0x1a0] ss:$16 sps:$4 sm:$0xff]   ;;  %v5699_v21 = vmov 0  }
  0x16   :  { %v4971_v41 = vld [vmem:[%s7502_s2 + $0x3a4] ss:$16 sps:$4 sm:$0xff]   ;;  %v4974_v43 = vld [vmem:[%s7502_s2 + $0x3a0] ss:$16 sps:$4 sm:$0xff]  }
  0x17   :  { %1272 = vmatpush1.bf16.msra.mxu0 %v4943_v22  ;;  %v4975_v44 = vld [vmem:[%s7502_s2 + $0x184] ss:$16 sps:$4 sm:$0xff]   ;;  %v4979_v50 = vld [vmem:[%s7502_s2 + $0x180] ss:$16 sps:$4 sm:$0xff]  }
  0x18   :  { %1315 = vmatpush1.bf16.msra.mxu1 %v4944_v23  ;;  %1273 = vmatprep.subr.bf16.mxu0 %v4945_v24  ;;  %v4977_v45 = vld [vmem:[%s7502_s2 + $0x384] ss:$16 sps:$4 sm:$0xff]   ;;  %v4980_v51 = vld [vmem:[%s7502_s2 + $0x380] ss:$16 sps:$4 sm:$0xff]   ;;  %v5014_v24 = vld [vmem:[%s7502_s2 + $0xe8] ss:$16 sps:$4 sm:$0xff]  }
  0x19   :  { %1316 = vmatprep.subr.bf16.mxu1 %v4947_v25  ;;  %v46_v47 = vld [vmem:[%s7503_s0 + $0x40] sm:$0xff]  ;;  %v48_v49 = vld [vmem:[%s7503_s0 + $0x50] sm:$0xff] }
  0x1a   :  { %v4981_v52 = vld [vmem:[%s7502_s2 + $0x164] ss:$16 sps:$4 sm:$0xff]   ;;  %v5919_v53 = vpack.c.bf16 %v46_v47, %v39_v46  ;;  %v5921_v54 = vpack.c.bf16 %v48_v49, %v41_v48  ;;  %v4985_v56 = vld [vmem:[%s7502_s2 + $0x160] ss:$16 sps:$4 sm:$0xff]   ;;  %v5044_v47 = vld [vmem:[%s7502_s2 + $0x48] ss:$16 sps:$4 sm:$0xff]  }
  0x1b   :  { %1274 = vmatpush1.bf16.msra.mxu0 %v4949_v26  ;;  %v4983_v55 = vld [vmem:[%s7502_s2 + $0x364] ss:$16 sps:$4 sm:$0xff]   ;;  %v4986_v57 = vld [vmem:[%s7502_s2 + $0x360] ss:$16 sps:$4 sm:$0xff]   ;;  %v5022_v26 = vld [vmem:[%s7502_s2 + $0xcc] ss:$16 sps:$4 sm:$0xff]  }
  0x1c   :  { %1317 = vmatpush1.bf16.msra.mxu1 %v4950_v27  ;;  %1275 = vmatprep.subr.bf16.mxu0 %v4951_v28  ;;  %v4987_v58 = vld [vmem:[%s7502_s2 + $0x144] ss:$16 sps:$4 sm:$0xff]   ;;  %v4991_v60 = vld [vmem:[%s7502_s2 + $0x140] ss:$16 sps:$4 sm:$0xff]   ;;  %v5020_v28 = vld [vmem:[%s7502_s2 + $0xc8] ss:$16 sps:$4 sm:$0xff]  }
  0x1d   :  { %1318 = vmatprep.subr.bf16.mxu1 %v4953_v29  ;;  %1293 = vmatprep.mubr.bf16.mxu0 %v5919_v53  ;;  %v4989_v59 = vld [vmem:[%s7502_s2 + $0x344] ss:$16 sps:$4 sm:$0xff]   ;;  %v4992_v61 = vld [vmem:[%s7502_s2 + $0x340] ss:$16 sps:$4 sm:$0xff]   ;;  %v5052_v49 = vld [vmem:[%s7502_s2 + $0x2c] ss:$16 sps:$4 sm:$0xff]  }
  0x1e   :  { %1336 = vmatprep.mubr.bf16.mxu1 %v5921_v54  ;;  %v4993_v62 = vld [vmem:[%s7502_s2 + $0x124] ss:$16 sps:$4 sm:$0xff]   ;;  %v4997_v0 = vld [vmem:[%s7502_s2 + $0x120] ss:$16 sps:$4 sm:$0xff]  }
  0x1f   :  { %1276 = vmatpush1.bf16.msra.mxu0 %v4955_v30  ;;  %v4995_v63 = vld [vmem:[%s7502_s2 + $0x324] ss:$16 sps:$4 sm:$0xff]   ;;  %v4998_v1 = vld [vmem:[%s7502_s2 + $0x320] ss:$16 sps:$4 sm:$0xff]   ;;  %v5028_v30 = vld [vmem:[%s7502_s2 + $0xac] ss:$16 sps:$4 sm:$0xff]  }
  0x20   :  { %1319 = vmatpush1.bf16.msra.mxu1 %v4956_v31  ;;  %1277 = vmatprep.subr.bf16.mxu0 %v4957_v32  ;;  %v4999_v2 = vld [vmem:[%s7502_s2 + $0x104] ss:$16 sps:$4 sm:$0xff]   ;;  %v5003_v4 = vld [vmem:[%s7502_s2 + $0x100] ss:$16 sps:$4 sm:$0xff]   ;;  %v5026_v32 = vld [vmem:[%s7502_s2 + $0xa8] ss:$16 sps:$4 sm:$0xff]  }
  0x21   :  { %1320 = vmatprep.subr.bf16.mxu1 %v4959_v33  ;;  %v5001_v3 = vld [vmem:[%s7502_s2 + $0x304] ss:$16 sps:$4 sm:$0xff]   ;;  %v5004_v5 = vld [vmem:[%s7502_s2 + $0x300] ss:$16 sps:$4 sm:$0xff]  }
  0x22   :  { %v38_v6 = vld [vmem:[%s7503_s0] sm:$0xff]  ;;  %v40_v8 = vld [vmem:[%s7503_s0 + $0x10] sm:$0xff] }
  0x23   :  { %1278 = vmatpush2.bf16.msra.mxu0 %v4961_v34  ;;  %v5007_v10 = vld [vmem:[%s7502_s2 + $0x4e4] ss:$16 sps:$4 sm:$0xff]   ;;  %v5988_v12 = vpack.c.bf16 %v45_v7, %v38_v6  ;;  %v5990_v13 = vpack.c.bf16 %v47_v9, %v40_v8  ;;  %v5005_v14 = vld [vmem:[%s7502_s2 + $0x4e0] ss:$16 sps:$4 sm:$0xff]   ;;  %v5034_v34 = vld [vmem:[%s7502_s2 + $0x8c] ss:$16 sps:$4 sm:$0xff]  }
  0x24   :  { %1321 = vmatpush2.bf16.msra.mxu1 %v4962_v35  ;;  %1279 = vmatprep.subr.bf16.mxu0 %v4963_v36  ;;  %v5010_v11 = vld [vmem:[%s7502_s2 + $0x604] ss:$16 sps:$4 sm:$0xff]   ;;  %v5008_v15 = vld [vmem:[%s7502_s2 + $0x600] ss:$16 sps:$4 sm:$0xff]   ;;  %v5032_v36 = vld [vmem:[%s7502_s2 + $0x88] ss:$16 sps:$4 sm:$0xff]  }
  0x25   :  { %1322 = vmatprep.subr.bf16.mxu1 %v4965_v37  ;;  %v5013_v16 = vld [vmem:[%s7502_s2 + $0x4c4] ss:$16 sps:$4 sm:$0xff]   ;;  %v5011_v18 = vld [vmem:[%s7502_s2 + $0x4c0] ss:$16 sps:$4 sm:$0xff]   ;;  %v5082_v6 = vld [vmem:[%s7502_s2 + $0x18c] ss:$16 sps:$4 sm:$0xff]  }
  0x26   :  { %v44_v19 = vld [vmem:[%s7503_s0 + $0x30] sm:$0xff]  ;;  %v5080_v8 = vld [vmem:[%s7502_s2 + $0x188] ss:$16 sps:$4 sm:$0xff]  }
  0x27   :  { %1280 = vmatpush2.bf16.msra.mxu0 %v4967_v38  ;;  %v5019_v22 = vld [vmem:[%s7502_s2 + $0x4a4] ss:$16 sps:$4 sm:$0xff]   ;;  %v6019_v23 = vpack.c.bf16 %v51_v20, %v44_v19  ;;  %v5017_v25 = vld [vmem:[%s7502_s2 + $0x4a0] ss:$16 sps:$4 sm:$0xff]   ;;  %v5040_v38 = vld [vmem:[%s7502_s2 + $0x6c] ss:$16 sps:$4 sm:$0xff]  }
  0x28   :  { %1323 = vmatpush2.bf16.msra.mxu1 %v4968_v39  ;;  %1281 = vmatprep.subr.bf16.mxu0 %v4969_v40  ;;  %v5025_v27 = vld [vmem:[%s7502_s2 + $0x484] ss:$16 sps:$4 sm:$0xff]   ;;  %v5023_v29 = vld [vmem:[%s7502_s2 + $0x480] ss:$16 sps:$4 sm:$0xff]   ;;  %v5038_v40 = vld [vmem:[%s7502_s2 + $0x68] ss:$16 sps:$4 sm:$0xff]  }
  0x29   :  { %1324 = vmatprep.subr.bf16.mxu1 %v4971_v41  ;;  %v5031_v31 = vld [vmem:[%s7502_s2 + $0x464] ss:$16 sps:$4 sm:$0xff]   ;;  %v5029_v33 = vld [vmem:[%s7502_s2 + $0x460] ss:$16 sps:$4 sm:$0xff]   ;;  %v43_v41 = vld [vmem:[%s7503_s0 + $0x28] sm:$0xff] }
  0x2a   :  { %v5037_v35 = vld [vmem:[%s7502_s2 + $0x444] ss:$16 sps:$4 sm:$0xff]   ;;  %v5035_v37 = vld [vmem:[%s7502_s2 + $0x440] ss:$16 sps:$4 sm:$0xff]  }
  0x2b   :  { %1282 = vmatpush2.bf16.msra.mxu0 %v4973_v42  ;;  %v5043_v39 = vld [vmem:[%s7502_s2 + $0x424] ss:$16 sps:$4 sm:$0xff]   ;;  %v5047_v48 = vld [vmem:[%s7502_s2 + $0x400] ss:$16 sps:$4 sm:$0xff]  }
  0x2c   :  { %1325 = vmatpush2.bf16.msra.mxu1 %v4974_v43  ;;  %1283 = vmatprep.subr.bf16.mxu0 %v4975_v44  ;;  %v50_v42 = vld [vmem:[%s7503_s0 + $0x60] sm:$0xff] }
  0x2d   :  { %1326 = vmatprep.subr.bf16.mxu1 %v4977_v45  ;;  %v5041_v43 = vld [vmem:[%s7502_s2 + $0x420] ss:$16 sps:$4 sm:$0xff]   ;;  %v6084_v44 = vpack.c.bf16 %v50_v42, %v43_v41  ;;  %v5046_v45 = vld [vmem:[%s7502_s2 + $0x4c] ss:$16 sps:$4 sm:$0xff]   ;;  %v5049_v46 = vld [vmem:[%s7502_s2 + $0x404] ss:$16 sps:$4 sm:$0xff]  }
  0x2e   :  { %v5085_v7 = vld [vmem:[%s7502_s2 + $0x544] ss:$16 sps:$4 sm:$0xff]   ;;  %v5083_v9 = vld [vmem:[%s7502_s2 + $0x540] ss:$16 sps:$4 sm:$0xff]   ;;  %v5122_v41 = vld [vmem:[%s7502_s2 + $0x4a8] ss:$16 sps:$4 sm:$0xff]  }
  0x2f   :  { %1284 = vmatpush2.bf16.msra.mxu0 %v4979_v50  ;;  %v5055_v50 = vld [vmem:[%s7502_s2 + $0x5e4] ss:$16 sps:$4 sm:$0xff]   ;;  %v5095_v19 = vld [vmem:[%s7502_s2 + $0x500] ss:$16 sps:$4 sm:$0xff]   ;;  %v5125_v42 = vld [vmem:[%s7502_s2 + $0x268] ss:$16 sps:$4 sm:$0xff]  }
  0x30   :  { %1327 = vmatpush2.bf16.msra.mxu1 %v4980_v51  ;;  %1285 = vmatprep.subr.bf16.mxu0 %v4981_v52  ;;  %v5050_v51 = vld [vmem:[%s7502_s2 + $0x28] ss:$16 sps:$4 sm:$0xff]   ;;  %v5053_v52 = vld [vmem:[%s7502_s2 + $0x5e0] ss:$16 sps:$4 sm:$0xff]  }
  0x31   :  { %1328 = vmatprep.subr.bf16.mxu1 %v4983_v55  ;;  %v5061_v55 = vld [vmem:[%s7502_s2 + $0x5c4] ss:$16 sps:$4 sm:$0xff]  }
  0x32   :  { %v42_v20 = vld [vmem:[%s7503_s0 + $0x20] sm:$0xff] }
  0x33   :  { %1286 = vmatpush2.bf16.msra.mxu0 %v4985_v56  ;;  %v5056_v56 = vld [vmem:[%s7502_s2 + $0x8] ss:$16 sps:$4 sm:$0xff]  }
  0x34   :  { %1329 = vmatpush2.bf16.msra.mxu1 %v4986_v57  ;;  %1287 = vmatprep.subr.bf16.mxu0 %v4987_v58  ;;  %v5059_v57 = vld [vmem:[%s7502_s2 + $0x5c0] ss:$16 sps:$4 sm:$0xff]   ;;  %v5064_v58 = vld [vmem:[%s7502_s2 + $0x1ec] ss:$16 sps:$4 sm:$0xff]  }
  0x35   :  { %1330 = vmatprep.subr.bf16.mxu1 %v4989_v59  ;;  %v5067_v59 = vld [vmem:[%s7502_s2 + $0x5a4] ss:$16 sps:$4 sm:$0xff]  }
  0x37   :  { %1288 = vmatpush2.bf16.msra.mxu0 %v4991_v60  ;;  %v5062_v60 = vld [vmem:[%s7502_s2 + $0x1e8] ss:$16 sps:$4 sm:$0xff]  }
  0x38   :  { %1331 = vmatpush2.bf16.msra.mxu1 %v4992_v61  ;;  %1289 = vmatprep.subr.bf16.mxu0 %v4993_v62  ;;  %v5065_v61 = vld [vmem:[%s7502_s2 + $0x5a0] ss:$16 sps:$4 sm:$0xff]   ;;  %v5070_v62 = vld [vmem:[%s7502_s2 + $0x1cc] ss:$16 sps:$4 sm:$0xff]  }
  0x39   :  { %1332 = vmatprep.subr.bf16.mxu1 %v4995_v63  ;;  %v5073_v63 = vld [vmem:[%s7502_s2 + $0x584] ss:$16 sps:$4 sm:$0xff]  }
  0x3b   :  { %1290 = vmatpush2.bf16.msra.mxu0 %v4997_v0  ;;  %v5068_v0 = vld [vmem:[%s7502_s2 + $0x1c8] ss:$16 sps:$4 sm:$0xff]  }
  0x3c   :  { %1333 = vmatpush2.bf16.msra.mxu1 %v4998_v1  ;;  %1291 = vmatprep.subr.bf16.mxu0 %v4999_v2  ;;  %v5071_v1 = vld [vmem:[%s7502_s2 + $0x580] ss:$16 sps:$4 sm:$0xff]   ;;  %v5076_v2 = vld [vmem:[%s7502_s2 + $0x1ac] ss:$16 sps:$4 sm:$0xff]  }
  0x3d   :  { %1334 = vmatprep.subr.bf16.mxu1 %v5001_v3  ;;  %v5079_v3 = vld [vmem:[%s7502_s2 + $0x564] ss:$16 sps:$4 sm:$0xff]  }
  0x3f   :  { %1292 = vmatpush2.bf16.msra.mxu0 %v5003_v4  ;;  %v5074_v4 = vld [vmem:[%s7502_s2 + $0x1a8] ss:$16 sps:$4 sm:$0xff]  }
  0x40   :  { %1335 = vmatpush2.bf16.msra.mxu1 %v5004_v5  ;;  %1347 = vmatprep.subr.bf16.mxu0 %v5007_v10  ;;  %v5077_v5 = vld [vmem:[%s7502_s2 + $0x560] ss:$16 sps:$4 sm:$0xff]   ;;  %v5088_v10 = vld [vmem:[%s7502_s2 + $0x16c] ss:$16 sps:$4 sm:$0xff]  }
  0x41   :  { %1404 = vmatprep.subr.bf16.mxu1 %v5010_v11  ;;  %v5091_v11 = vld [vmem:[%s7502_s2 + $0x524] ss:$16 sps:$4 sm:$0xff]  }
  0x42   :  { %1294 = vmatmul.mubr.bf16.vlgmr.msra.gmra.mxu0 %v5988_v12 }
  0x43   :  { %1337 = vmatmul.mubr.bf16.vlgmr.msra.gmra.mxu1 %v5990_v13  ;;  %1348 = vmatpush1.bf16.msra.mxu0 %v5005_v14  ;;  %v5086_v14 = vld [vmem:[%s7502_s2 + $0x168] ss:$16 sps:$4 sm:$0xff]  }
  0x44   :  { %1405 = vmatpush1.bf16.msra.mxu1 %v5008_v15  ;;  %1349 = vmatprep.subr.bf16.mxu0 %v5013_v16  ;;  %v5089_v15 = vld [vmem:[%s7502_s2 + $0x520] ss:$16 sps:$4 sm:$0xff]   ;;  %v5094_v16 = vld [vmem:[%s7502_s2 + $0x14c] ss:$16 sps:$4 sm:$0xff]  }
  0x45   :  { %1422 = vmatprep.mubr.bf16.mxu1 %v5699_v21  ;;  %1433 = vmatprep.subr.bf16.mxu1 %v5016_v17  ;;  %v5097_v17 = vld [vmem:[%s7502_s2 + $0x504] ss:$16 sps:$4 sm:$0xff]  }
  0x46   :  { %1379 = vmatprep.mubr.bf16.mxu0 %v6084_v44 }
  0x47   :  { %1350 = vmatpush1.bf16.msra.mxu0 %v5011_v18  ;;  %v5092_v18 = vld [vmem:[%s7502_s2 + $0x148] ss:$16 sps:$4 sm:$0xff]  }
  0x48   :  { %1351 = vmatprep.subr.bf16.mxu0 %v5019_v22  ;;  %v49_v22 = vld [vmem:[%s7503_s0 + $0x58] sm:$0xff] }
  0x4b   :  { %4526 = vmatmul.mubr.msk.bf16.vlgmr.msra.gmra.mxu1 %vm1257_vm0, %v6019_v23  ;;  %1352 = vmatpush1.bf16.msra.mxu0 %v5017_v25  ;;  %v5103_v25 = vld [vmem:[%s7502_s2 + $0x2ec] ss:$16 sps:$4 sm:$0xff]  }
  0x4c   :  { %1434 = vmatpush1.bf16.msra.mxu1 %v5014_v24  ;;  %1353 = vmatprep.subr.bf16.mxu0 %v5025_v27  ;;  %v5100_v24 = vld [vmem:[%s7502_s2 + $0x12c] ss:$16 sps:$4 sm:$0xff]   ;;  %v5098_v27 = vld [vmem:[%s7502_s2 + $0x128] ss:$16 sps:$4 sm:$0xff]  }
  0x4d   :  { %1435 = vmatprep.subr.bf16.mxu1 %v5022_v26  ;;  %1465 = vmatprep.mubr.bf16.mxu1 %v5919_v53  ;;  %v5058_v53 = vld [vmem:[%s7502_s2 + $0xc] ss:$16 sps:$4 sm:$0xff]   ;;  %v6207_v26 = vpack.c.bf16 %v49_v22, %v42_v20  ;;  %v5182_v20 = vld [vmem:[%s7502_s2 + $0x568] ss:$16 sps:$4 sm:$0xff]  }
  0x4e   :  { %v5185_v22 = vld [vmem:[%s7502_s2 + $0x328] ss:$16 sps:$4 sm:$0xff]  }
  0x4f   :  { %1354 = vmatpush1.bf16.msra.mxu0 %v5023_v29  ;;  %v5106_v29 = vld [vmem:[%s7502_s2 + $0x10c] ss:$16 sps:$4 sm:$0xff]  }
  0x50   :  { %1436 = vmatpush1.bf16.msra.mxu1 %v5020_v28  ;;  %1355 = vmatprep.subr.bf16.mxu0 %v5031_v31  ;;  %v5101_v28 = vld [vmem:[%s7502_s2 + $0x2e8] ss:$16 sps:$4 sm:$0xff]  }
  0x51   :  { %1437 = vmatprep.subr.bf16.mxu1 %v5028_v30  ;;  %v5109_v30 = vld [vmem:[%s7502_s2 + $0x2cc] ss:$16 sps:$4 sm:$0xff]   ;;  %v5104_v31 = vld [vmem:[%s7502_s2 + $0x108] ss:$16 sps:$4 sm:$0xff]  }
  0x53   :  { %1356 = vmatpush1.bf16.msra.mxu0 %v5029_v33  ;;  %v5112_v33 = vld [vmem:[%s7502_s2 + $0x4ec] ss:$16 sps:$4 sm:$0xff]  }
  0x54   :  { %1438 = vmatpush1.bf16.msra.mxu1 %v5026_v32  ;;  %1357 = vmatprep.subr.bf16.mxu0 %v5037_v35  ;;  %v5107_v32 = vld [vmem:[%s7502_s2 + $0x2c8] ss:$16 sps:$4 sm:$0xff]  }
  0x55   :  { %1439 = vmatprep.subr.bf16.mxu1 %v5034_v34  ;;  %v5115_v34 = vld [vmem:[%s7502_s2 + $0x2ac] ss:$16 sps:$4 sm:$0xff]   ;;  %v5110_v35 = vld [vmem:[%s7502_s2 + $0x4e8] ss:$16 sps:$4 sm:$0xff]  }
  0x57   :  { %1358 = vmatpush1.bf16.msra.mxu0 %v5035_v37  ;;  %v5118_v37 = vld [vmem:[%s7502_s2 + $0x4cc] ss:$16 sps:$4 sm:$0xff]  }
  0x58   :  { %1440 = vmatpush1.bf16.msra.mxu1 %v5032_v36  ;;  %1359 = vmatprep.subr.bf16.mxu0 %v5043_v39  ;;  %v5113_v36 = vld [vmem:[%s7502_s2 + $0x2a8] ss:$16 sps:$4 sm:$0xff]  }
  0x59   :  { %1441 = vmatprep.subr.bf16.mxu1 %v5040_v38  ;;  %v5116_v38 = vld [vmem:[%s7502_s2 + $0x4c8] ss:$16 sps:$4 sm:$0xff]  }
  0x5a   :  { %v5119_v39 = vld [vmem:[%s7502_s2 + $0x288] ss:$16 sps:$4 sm:$0xff]  }
  0x5b   :  { %1360 = vmatpush1.bf16.msra.mxu0 %v5041_v43  ;;  %v5130_v43 = vld [vmem:[%s7502_s2 + $0x48c] ss:$16 sps:$4 sm:$0xff]  }
  0x5c   :  { %1442 = vmatpush1.bf16.msra.mxu1 %v5038_v40  ;;  %1361 = vmatprep.subr.bf16.mxu0 %v5049_v46  ;;  %v5124_v40 = vld [vmem:[%s7502_s2 + $0x4ac] ss:$16 sps:$4 sm:$0xff]   ;;  %v5131_v46 = vld [vmem:[%s7502_s2 + $0x248] ss:$16 sps:$4 sm:$0xff]  }
  0x5d   :  { %1443 = vmatprep.subr.bf16.mxu1 %v5046_v45  ;;  %v5128_v45 = vld [vmem:[%s7502_s2 + $0x488] ss:$16 sps:$4 sm:$0xff]  }
  0x5f   :  { %1362 = vmatpush1.bf16.msra.mxu0 %v5047_v48  ;;  %v5139_v48 = vld [vmem:[%s7502_s2 + $0x22c] ss:$16 sps:$4 sm:$0xff]  }
  0x60   :  { %1444 = vmatpush1.bf16.msra.mxu1 %v5044_v47  ;;  %1363 = vmatprep.subr.bf16.mxu0 %v5055_v50  ;;  %v5136_v47 = vld [vmem:[%s7502_s2 + $0x46c] ss:$16 sps:$4 sm:$0xff]   ;;  %v5137_v50 = vld [vmem:[%s7502_s2 + $0x228] ss:$16 sps:$4 sm:$0xff]  }
  0x61   :  { %1445 = vmatprep.subr.bf16.mxu1 %v5052_v49  ;;  %v5134_v49 = vld [vmem:[%s7502_s2 + $0x468] ss:$16 sps:$4 sm:$0xff]  }
  0x63   :  { %1364 = vmatpush2.bf16.msra.mxu0 %v5053_v52  ;;  %v5145_v52 = vld [vmem:[%s7502_s2 + $0x20c] ss:$16 sps:$4 sm:$0xff]  }
  0x64   :  { %1446 = vmatpush1.bf16.msra.mxu1 %v5050_v51  ;;  %1365 = vmatprep.subr.bf16.mxu0 %v5061_v55  ;;  %v5142_v51 = vld [vmem:[%s7502_s2 + $0x44c] ss:$16 sps:$4 sm:$0xff]   ;;  %v5143_v55 = vld [vmem:[%s7502_s2 + $0x208] ss:$16 sps:$4 sm:$0xff]  }
  0x65   :  { %1447 = vmatprep.subr.bf16.mxu1 %v5058_v53  ;;  %v5140_v53 = vld [vmem:[%s7502_s2 + $0x448] ss:$16 sps:$4 sm:$0xff]  }
  0x67   :  { %1366 = vmatpush2.bf16.msra.mxu0 %v5059_v57  ;;  %v5151_v57 = vld [vmem:[%s7502_s2 + $0x3ec] ss:$16 sps:$4 sm:$0xff]  }
  0x68   :  { %1448 = vmatpush1.bf16.msra.mxu1 %v5056_v56  ;;  %1367 = vmatprep.subr.bf16.mxu0 %v5067_v59  ;;  %v5148_v56 = vld [vmem:[%s7502_s2 + $0x42c] ss:$16 sps:$4 sm:$0xff]   ;;  %v5149_v59 = vld [vmem:[%s7502_s2 + $0x3e8] ss:$16 sps:$4 sm:$0xff]  }
  0x69   :  { %1449 = vmatprep.subr.bf16.mxu1 %v5064_v58  ;;  %v5146_v58 = vld [vmem:[%s7502_s2 + $0x428] ss:$16 sps:$4 sm:$0xff]  }
  0x6b   :  { %1368 = vmatpush2.bf16.msra.mxu0 %v5065_v61  ;;  %v5157_v61 = vld [vmem:[%s7502_s2 + $0x3cc] ss:$16 sps:$4 sm:$0xff]  }
  0x6c   :  { %1450 = vmatpush2.bf16.msra.mxu1 %v5062_v60  ;;  %1369 = vmatprep.subr.bf16.mxu0 %v5073_v63  ;;  %v5154_v60 = vld [vmem:[%s7502_s2 + $0x40c] ss:$16 sps:$4 sm:$0xff]   ;;  %v5155_v63 = vld [vmem:[%s7502_s2 + $0x3c8] ss:$16 sps:$4 sm:$0xff]  }
  0x6d   :  { %1451 = vmatprep.subr.bf16.mxu1 %v5070_v62  ;;  %v5152_v62 = vld [vmem:[%s7502_s2 + $0x408] ss:$16 sps:$4 sm:$0xff]  }
  0x6f   :  { %1370 = vmatpush2.bf16.msra.mxu0 %v5071_v1  ;;  %v5163_v1 = vld [vmem:[%s7502_s2 + $0x3ac] ss:$16 sps:$4 sm:$0xff]  }
  0x70   :  { %1452 = vmatpush2.bf16.msra.mxu1 %v5068_v0  ;;  %1371 = vmatprep.subr.bf16.mxu0 %v5079_v3  ;;  %v5160_v0 = vld [vmem:[%s7502_s2 + $0x5ec] ss:$16 sps:$4 sm:$0xff]   ;;  %v5161_v3 = vld [vmem:[%s7502_s2 + $0x3a8] ss:$16 sps:$4 sm:$0xff]  }
  0x71   :  { %1453 = vmatprep.subr.bf16.mxu1 %v5076_v2  ;;  %v5158_v2 = vld [vmem:[%s7502_s2 + $0x5e8] ss:$16 sps:$4 sm:$0xff]  }
  0x73   :  { %1372 = vmatpush2.bf16.msra.mxu0 %v5077_v5  ;;  %v5169_v5 = vld [vmem:[%s7502_s2 + $0x38c] ss:$16 sps:$4 sm:$0xff]  }
  0x74   :  { %1454 = vmatpush2.bf16.msra.mxu1 %v5074_v4  ;;  %1373 = vmatprep.subr.bf16.mxu0 %v5085_v7  ;;  %v5166_v4 = vld [vmem:[%s7502_s2 + $0x5cc] ss:$16 sps:$4 sm:$0xff]   ;;  %v5167_v7 = vld [vmem:[%s7502_s2 + $0x388] ss:$16 sps:$4 sm:$0xff]  }
  0x75   :  { %1455 = vmatprep.subr.bf16.mxu1 %v5082_v6  ;;  %v5164_v6 = vld [vmem:[%s7502_s2 + $0x5c8] ss:$16 sps:$4 sm:$0xff]  }
  0x77   :  { %1374 = vmatpush2.bf16.msra.mxu0 %v5083_v9  ;;  %v5175_v9 = vld [vmem:[%s7502_s2 + $0x36c] ss:$16 sps:$4 sm:$0xff]  }
  0x78   :  { %1456 = vmatpush2.bf16.msra.mxu1 %v5080_v8  ;;  %1375 = vmatprep.subr.bf16.mxu0 %v5091_v11  ;;  %v5172_v8 = vld [vmem:[%s7502_s2 + $0x5ac] ss:$16 sps:$4 sm:$0xff]   ;;  %v5173_v11 = vld [vmem:[%s7502_s2 + $0x368] ss:$16 sps:$4 sm:$0xff]  }
  0x79   :  { %1457 = vmatprep.subr.bf16.mxu1 %v5088_v10  ;;  %v5170_v10 = vld [vmem:[%s7502_s2 + $0x5a8] ss:$16 sps:$4 sm:$0xff]  }
  0x7b   :  { %1376 = vmatpush2.bf16.msra.mxu0 %v5089_v15  ;;  %v5181_v15 = vld [vmem:[%s7502_s2 + $0x34c] ss:$16 sps:$4 sm:$0xff]  }
  0x7c   :  { %1458 = vmatpush2.bf16.msra.mxu1 %v5086_v14  ;;  %1377 = vmatprep.subr.bf16.mxu0 %v5097_v17  ;;  %v5178_v14 = vld [vmem:[%s7502_s2 + $0x58c] ss:$16 sps:$4 sm:$0xff]   ;;  %v5179_v17 = vld [vmem:[%s7502_s2 + $0x348] ss:$16 sps:$4 sm:$0xff]  }
  0x7d   :  { %1459 = vmatprep.subr.bf16.mxu1 %v5094_v16  ;;  %v5176_v16 = vld [vmem:[%s7502_s2 + $0x588] ss:$16 sps:$4 sm:$0xff]  }
  0x7f   :  { %1378 = vmatpush2.bf16.msra.mxu0 %v5095_v19  ;;  %v5187_v19 = vld [vmem:[%s7502_s2 + $0x32c] ss:$16 sps:$4 sm:$0xff]  }
  0x80   :  { %1460 = vmatpush2.bf16.msra.mxu1 %v5092_v18  ;;  %1476 = vmatprep.subr.bf16.mxu0 %v5103_v25  ;;  %v5184_v18 = vld [vmem:[%s7502_s2 + $0x56c] ss:$16 sps:$4 sm:$0xff]  }
  0x81   :  { %1461 = vmatprep.subr.bf16.mxu1 %v5100_v24  ;;  %v5190_v24 = vld [vmem:[%s7502_s2 + $0x54c] ss:$16 sps:$4 sm:$0xff]  }
  0x82   :  { %1380 = vmatmul.mubr.bf16.vlgmr.msra.gmra.mxu0 %v6207_v26  ;;  %v5193_v25 = vld [vmem:[%s7502_s2 + $0x30c] ss:$16 sps:$4 sm:$0xff]  }
  0x83   :  { %1477 = vmatpush1.bf16.msra.mxu0 %v5101_v28  ;;  %1508 = vmatprep.mubr.bf16.mxu0 %v5921_v54  ;;  %v5121_v54 = vld [vmem:[%s7502_s2 + $0x28c] ss:$16 sps:$4 sm:$0xff]   ;;  %v5191_v28 = vld [vmem:[%s7502_s2 + $0x308] ss:$16 sps:$4 sm:$0xff]  }
  0x84   :  { %1462 = vmatpush2.bf16.msra.mxu1 %v5098_v27  ;;  %1478 = vmatprep.subr.bf16.mxu0 %v5109_v30  ;;  %v5188_v27 = vld [vmem:[%s7502_s2 + $0x548] ss:$16 sps:$4 sm:$0xff]   ;;  %v5199_v30 = vld [vmem:[%s7502_s2 + $0x60c] ss:$16 sps:$4 sm:$0xff]  }
  0x85   :  { %1463 = vmatprep.subr.bf16.mxu1 %v5106_v29  ;;  %v5196_v29 = vld [vmem:[%s7502_s2 + $0x52c] ss:$16 sps:$4 sm:$0xff]  }
  0x87   :  { %1479 = vmatpush1.bf16.msra.mxu0 %v5107_v32  ;;  %v5197_v32 = vld [vmem:[%s7502_s2 + $0x608] ss:$16 sps:$4 sm:$0xff]  }
  0x88   :  { %1464 = vmatpush2.bf16.msra.mxu1 %v5104_v31  ;;  %1480 = vmatprep.subr.bf16.mxu0 %v5115_v34  ;;  %v5194_v31 = vld [vmem:[%s7502_s2 + $0x528] ss:$16 sps:$4 sm:$0xff]   ;;  %v5205_v34 = vld [vmem:[%s7504_s4 + $0x74] ss:$8 sps:$4 sm:$0xff]  }
  0x89   :  { %1519 = vmatprep.subr.bf16.mxu1 %v5112_v33  ;;  %v5202_v33 = vld [vmem:[%s7502_s2 + $0x50c] ss:$16 sps:$4 sm:$0xff]  }
  0x8b   :  { %1466 = vmatmul.mubr.bf16.vlgmr.msra.gmra.mxu1 %v5988_v12  ;;  %1481 = vmatpush1.bf16.msra.mxu0 %v5113_v36  ;;  %v5127_v12 = vld [vmem:[%s7502_s2 + $0x26c] ss:$16 sps:$4 sm:$0xff]   ;;  %v5203_v36 = vld [vmem:[%s7504_s4 + $0x70] ss:$8 sps:$4 sm:$0xff]  }
  0x8c   :  { %1520 = vmatpush1.bf16.msra.mxu1 %v5110_v35  ;;  %1482 = vmatprep.subr.bf16.mxu0 %v5121_v54  ;;  %v5200_v35 = vld [vmem:[%s7502_s2 + $0x508] ss:$16 sps:$4 sm:$0xff]   ;;  %v5211_v54 = vld [vmem:[%s7504_s4 + $0x54] ss:$8 sps:$4 sm:$0xff]  }
  0x8d   :  { %1521 = vmatprep.subr.bf16.mxu1 %v5118_v37  ;;  %1551 = vmatprep.mubr.bf16.mxu1 %v6084_v44  ;;  %v5133_v44 = vld [vmem:[%s7502_s2 + $0x24c] ss:$16 sps:$4 sm:$0xff]  }
  0x8e   :  { %v5208_v37 = vld [vmem:[%s7504_s4 + $0x64] ss:$8 sps:$4 sm:$0xff]  }
  0x8f   :  { %1483 = vmatpush1.bf16.msra.mxu0 %v5119_v39  ;;  %v5253_v39 = vld [vmem:[%s7504_s4 + $0x174] ss:$8 sps:$4 sm:$0xff]  }
  0x90   :  { %1522 = vmatpush1.bf16.msra.mxu1 %v5116_v38  ;;  %1484 = vmatprep.subr.bf16.mxu0 %v5127_v12  ;;  %v5209_v38 = vld [vmem:[%s7504_s4 + $0x50] ss:$8 sps:$4 sm:$0xff]   ;;  %v5256_v12 = vld [vmem:[%s7504_s4 + $0x164] ss:$8 sps:$4 sm:$0xff]  }
  0x91   :  { %1523 = vmatprep.subr.bf16.mxu1 %v5124_v40  ;;  %v5212_v40 = vld [vmem:[%s7504_s4 + $0x40] ss:$8 sps:$4 sm:$0xff]  }
  0x93   :  { %1485 = vmatpush1.bf16.msra.mxu0 %v5125_v42  ;;  %v5254_v42 = vld [vmem:[%s7504_s4 + $0x160] ss:$8 sps:$4 sm:$0xff]  }
  0x94   :  { %1524 = vmatpush1.bf16.msra.mxu1 %v5122_v41  ;;  %1486 = vmatprep.subr.bf16.mxu0 %v5133_v44  ;;  %v5217_v41 = vld [vmem:[%s7504_s4 + $0x34] ss:$8 sps:$4 sm:$0xff]   ;;  %v5215_v44 = vld [vmem:[%s7504_s4 + $0x30] ss:$8 sps:$4 sm:$0xff]  }
  0x95   :  { %1525 = vmatprep.subr.bf16.mxu1 %v5130_v43  ;;  %v5259_v43 = vld [vmem:[%s7504_s4 + $0x154] ss:$8 sps:$4 sm:$0xff]  }
  0x97   :  { %1487 = vmatpush1.bf16.msra.mxu0 %v5131_v46  ;;  %v5257_v46 = vld [vmem:[%s7504_s4 + $0x150] ss:$8 sps:$4 sm:$0xff]  }
  0x98   :  { %1526 = vmatpush1.bf16.msra.mxu1 %v5128_v45  ;;  %1488 = vmatprep.subr.bf16.mxu0 %v5139_v48  ;;  %v5220_v45 = vld [vmem:[%s7504_s4 + $0x24] ss:$8 sps:$4 sm:$0xff]   ;;  %v5218_v48 = vld [vmem:[%s7504_s4 + $0x20] ss:$8 sps:$4 sm:$0xff]  }
  0x99   :  { %1527 = vmatprep.subr.bf16.mxu1 %v5136_v47  ;;  %v5262_v47 = vld [vmem:[%s7504_s4 + $0x144] ss:$8 sps:$4 sm:$0xff]  }
  0x9b   :  { %1489 = vmatpush1.bf16.msra.mxu0 %v5137_v50  ;;  %v5260_v50 = vld [vmem:[%s7504_s4 + $0x140] ss:$8 sps:$4 sm:$0xff]  }
  0x9c   :  { %1528 = vmatpush1.bf16.msra.mxu1 %v5134_v49  ;;  %1490 = vmatprep.subr.bf16.mxu0 %v5145_v52  ;;  %v5223_v49 = vld [vmem:[%s7504_s4 + $0x14] ss:$8 sps:$4 sm:$0xff]   ;;  %v5221_v52 = vld [vmem:[%s7504_s4 + $0x10] ss:$8 sps:$4 sm:$0xff]  }
  0x9d   :  { %1529 = vmatprep.subr.bf16.mxu1 %v5142_v51  ;;  %v5265_v51 = vld [vmem:[%s7504_s4 + $0x134] ss:$8 sps:$4 sm:$0xff]  }
  0x9f   :  { %1491 = vmatpush1.bf16.msra.mxu0 %v5143_v55  ;;  %v5263_v55 = vld [vmem:[%s7504_s4 + $0x130] ss:$8 sps:$4 sm:$0xff]  }
  0xa0   :  { %1530 = vmatpush1.bf16.msra.mxu1 %v5140_v53  ;;  %1492 = vmatprep.subr.bf16.mxu0 %v5151_v57  ;;  %v5226_v53 = vld [vmem:[%s7504_s4 + $0x4] ss:$8 sps:$4 sm:$0xff]   ;;  %v5224_v57 = vld [vmem:[%s7504_s4] ss:$8 sps:$4 sm:$0xff]  }
  0xa1   :  { %1531 = vmatprep.subr.bf16.mxu1 %v5148_v56  ;;  %v5268_v56 = vld [vmem:[%s7504_s4 + $0x124] ss:$8 sps:$4 sm:$0xff]  }
  0xa3   :  { %1493 = vmatpush2.bf16.msra.mxu0 %v5149_v59  ;;  %v5266_v59 = vld [vmem:[%s7504_s4 + $0x120] ss:$8 sps:$4 sm:$0xff]  }
  0xa4   :  { %1532 = vmatpush1.bf16.msra.mxu1 %v5146_v58  ;;  %1494 = vmatprep.subr.bf16.mxu0 %v5157_v61  ;;  %v5229_v58 = vld [vmem:[%s7504_s4 + $0xf4] ss:$8 sps:$4 sm:$0xff]   ;;  %v5227_v61 = vld [vmem:[%s7504_s4 + $0xf0] ss:$8 sps:$4 sm:$0xff]  }
  0xa5   :  { %1533 = vmatprep.subr.bf16.mxu1 %v5154_v60  ;;  %v5271_v60 = vld [vmem:[%s7504_s4 + $0x114] ss:$8 sps:$4 sm:$0xff]  }
  0xa7   :  { %1495 = vmatpush2.bf16.msra.mxu0 %v5155_v63  ;;  %v5269_v63 = vld [vmem:[%s7504_s4 + $0x110] ss:$8 sps:$4 sm:$0xff]  }
  0xa8   :  { %1534 = vmatpush1.bf16.msra.mxu1 %v5152_v62  ;;  %1496 = vmatprep.subr.bf16.mxu0 %v5163_v1  ;;  %v5232_v62 = vld [vmem:[%s7504_s4 + $0xe4] ss:$8 sps:$4 sm:$0xff]   ;;  %v5230_v1 = vld [vmem:[%s7504_s4 + $0xe0] ss:$8 sps:$4 sm:$0xff]  }
  0xa9   :  { %1535 = vmatprep.subr.bf16.mxu1 %v5160_v0  ;;  %v5274_v0 = vld [vmem:[%s7504_s4 + $0x104] ss:$8 sps:$4 sm:$0xff]  }
  0xab   :  { %1497 = vmatpush2.bf16.msra.mxu0 %v5161_v3  ;;  %v5272_v3 = vld [vmem:[%s7504_s4 + $0x100] ss:$8 sps:$4 sm:$0xff]  }
  0xac   :  { %1536 = vmatpush2.bf16.msra.mxu1 %v5158_v2  ;;  %1498 = vmatprep.subr.bf16.mxu0 %v5169_v5  ;;  %v5235_v2 = vld [vmem:[%s7504_s4 + $0xd4] ss:$8 sps:$4 sm:$0xff]   ;;  %v5233_v5 = vld [vmem:[%s7504_s4 + $0xd0] ss:$8 sps:$4 sm:$0xff]  }
  0xad   :  { %1537 = vmatprep.subr.bf16.mxu1 %v5166_v4  ;;  %v5277_v4 = vld [vmem:[%s7504_s4 + $0x1f4] ss:$8 sps:$4 sm:$0xff]  }
  0xaf   :  { %1499 = vmatpush2.bf16.msra.mxu0 %v5167_v7  ;;  %v5275_v7 = vld [vmem:[%s7504_s4 + $0x1f0] ss:$8 sps:$4 sm:$0xff]  }
  0xb0   :  { %1538 = vmatpush2.bf16.msra.mxu1 %v5164_v6  ;;  %1500 = vmatprep.subr.bf16.mxu0 %v5175_v9  ;;  %v5238_v6 = vld [vmem:[%s7504_s4 + $0xc4] ss:$8 sps:$4 sm:$0xff]   ;;  %v5236_v9 = vld [vmem:[%s7504_s4 + $0xc0] ss:$8 sps:$4 sm:$0xff]  }
  0xb1   :  { %1539 = vmatprep.subr.bf16.mxu1 %v5172_v8  ;;  %v5280_v8 = vld [vmem:[%s7504_s4 + $0x1e4] ss:$8 sps:$4 sm:$0xff]  }
  0xb3   :  { %1501 = vmatpush2.bf16.msra.mxu0 %v5173_v11  ;;  %v5278_v11 = vld [vmem:[%s7504_s4 + $0x1e0] ss:$8 sps:$4 sm:$0xff]  }
  0xb4   :  { %1540 = vmatpush2.bf16.msra.mxu1 %v5170_v10  ;;  %1502 = vmatprep.subr.bf16.mxu0 %v5181_v15  ;;  %v5241_v10 = vld [vmem:[%s7504_s4 + $0xb4] ss:$8 sps:$4 sm:$0xff]   ;;  %v5239_v15 = vld [vmem:[%s7504_s4 + $0xb0] ss:$8 sps:$4 sm:$0xff]  }
  0xb5   :  { %1541 = vmatprep.subr.bf16.mxu1 %v5178_v14  ;;  %v5283_v14 = vld [vmem:[%s7504_s4 + $0x1d4] ss:$8 sps:$4 sm:$0xff]  }
  0xb7   :  { %1503 = vmatpush2.bf16.msra.mxu0 %v5179_v17  ;;  %v5281_v17 = vld [vmem:[%s7504_s4 + $0x1d0] ss:$8 sps:$4 sm:$0xff]  }
  0xb8   :  { %1542 = vmatpush2.bf16.msra.mxu1 %v5176_v16  ;;  %1504 = vmatprep.subr.bf16.mxu0 %v5187_v19  ;;  %v5244_v16 = vld [vmem:[%s7504_s4 + $0xa4] ss:$8 sps:$4 sm:$0xff]   ;;  %v5247_v19 = vld [vmem:[%s7504_s4 + $0x94] ss:$8 sps:$4 sm:$0xff]  }
  0xb9   :  { %1543 = vmatprep.subr.bf16.mxu1 %v5184_v18  ;;  %v5242_v18 = vld [vmem:[%s7504_s4 + $0xa0] ss:$8 sps:$4 sm:$0xff]  }
  0xbb   :  { %1505 = vmatpush2.bf16.msra.mxu0 %v5185_v22  ;;  %v5250_v22 = vld [vmem:[%s7504_s4 + $0x84] ss:$8 sps:$4 sm:$0xff]  }
  0xbc   :  { %1544 = vmatpush2.bf16.msra.mxu1 %v5182_v20  ;;  %1506 = vmatprep.subr.bf16.mxu0 %v5193_v25  ;;  %v5245_v20 = vld [vmem:[%s7504_s4 + $0x90] ss:$8 sps:$4 sm:$0xff]   ;;  %v5286_v25 = vld [vmem:[%s7504_s4 + $0x1c4] ss:$8 sps:$4 sm:$0xff]  }
  0xbd   :  { %1545 = vmatprep.subr.bf16.mxu1 %v5190_v24  ;;  %v5248_v24 = vld [vmem:[%s7504_s4 + $0x80] ss:$8 sps:$4 sm:$0xff]  }
  0xbf   :  { %1507 = vmatpush2.bf16.msra.mxu0 %v5191_v28  ;;  %v5289_v28 = vld [vmem:[%s7504_s4 + $0x1b4] ss:$8 sps:$4 sm:$0xff]  }
  0xc0   :  { %1546 = vmatpush2.bf16.msra.mxu1 %v5188_v27  ;;  %1576 = vmatprep.subr.bf16.mxu0 %v5199_v30  ;;  %v5284_v27 = vld [vmem:[%s7504_s4 + $0x1c0] ss:$8 sps:$4 sm:$0xff]   ;;  %v5292_v30 = vld [vmem:[%s7504_s4 + $0x1a4] ss:$8 sps:$4 sm:$0xff]  }
  0xc1   :  { %1547 = vmatprep.subr.bf16.mxu1 %v5196_v29  ;;  %v5287_v29 = vld [vmem:[%s7504_s4 + $0x1b0] ss:$8 sps:$4 sm:$0xff]  }
  0xc2   :  { %1509 = vmatmul.mubr.bf16.vlgmr.msra.gmra.mxu0 %v5990_v13  ;;  %v5206_v13 = vld [vmem:[%s7504_s4 + $0x60] ss:$8 sps:$4 sm:$0xff]  }
  0xc3   :  { %1577 = vmatpush1.bf16.msra.mxu0 %v5197_v32  ;;  %1594 = vmatprep.mubr.bf16.mxu0 %v5699_v21  ;;  %v5295_v32 = vld [vmem:[%s7504_s4 + $0x194] ss:$8 sps:$4 sm:$0xff]  }
  0xc4   :  { %1548 = vmatpush2.bf16.msra.mxu1 %v5194_v31  ;;  %2013 = vmatprep.subr.bf16.mxu0 %v5205_v34  ;;  %v5290_v31 = vld [vmem:[%s7504_s4 + $0x1a0] ss:$8 sps:$4 sm:$0xff]   ;;  %v5298_v34 = vld [vmem:[%s7504_s4 + $0x184] ss:$8 sps:$4 sm:$0xff]  }
  0xc5   :  { %1549 = vmatprep.subr.bf16.mxu1 %v5202_v33  ;;  %v5293_v33 = vld [vmem:[%s7504_s4 + $0x190] ss:$8 sps:$4 sm:$0xff]  }
  0xc8   :  { %1550 = vmatpush2.bf16.msra.mxu1 %v5200_v35  ;;  %v5296_v35 = vld [vmem:[%s7504_s4 + $0x180] ss:$8 sps:$4 sm:$0xff]  }
  0xc9   :  { %2056 = vmatprep.subr.bf16.mxu1 %v5253_v39 }
  0xca   :  { %4527 = vmatmul.mubr.msk.bf16.vlgmr.msra.gmra.mxu0 %vm1257_vm0, %v6019_v23  ;;  %v5214_v23 = vld [vmem:[%s7504_s4 + $0x44] ss:$8 sps:$4 sm:$0xff]  }
  0xcb   :  { %1552 = vmatmul.mubr.bf16.vlgmr.msra.gmra.mxu1 %v6207_v26  ;;  %2014 = vmatpush1.bf16.msra.mxu0 %v5203_v36  ;;  %v5251_v26 = vld [vmem:[%s7504_s4 + $0x170] ss:$8 sps:$4 sm:$0xff]  }
  0xcc   :  { %2015 = vmatprep.subr.bf16.mxu0 %v5208_v37  ;;  %2057 = vmatpush1.bf16.msra.mxu1 %v5251_v26  ;;  %v257_v37 = vlaneseq }
  0xcd   :  { %2058 = vmatprep.subr.bf16.mxu1 %v5256_v12  ;;  %v255_v12 = vld [vmem:[%s7505_s3] sm:$0xf] }
  0xcf   :  { %2016 = vmatpush1.bf16.msra.mxu0 %v5206_v13 }
  0xd0   :  { %2017 = vmatprep.subr.bf16.mxu0 %v5211_v54  ;;  %2059 = vmatpush1.bf16.msra.mxu1 %v5254_v42  ;;  %v6614_v54 = vshrl.u32 %v257_v37, 7 }
  0xd1   :  { %2060 = vmatprep.subr.bf16.mxu1 %v5259_v43 }
  0xd2   :  { %v6617_v26 = vsub.s32 1, %v6614_v54  ;;  %v6620_v39 = vsub.s32 0, %v6614_v54 }
  0xd3   :  { %2018 = vmatpush1.bf16.msra.mxu0 %v5209_v38 }
  0xd4   :  { %2019 = vmatprep.subr.bf16.mxu0 %v5214_v23  ;;  %2061 = vmatpush1.bf16.msra.mxu1 %v5257_v46  ;;  %v264_v42 = vrot.slane %v255_v12, %v6617_v26  ;;  %v260_v43 = vrot.slane %v255_v12, %v6620_v39 }
  0xd5   :  { %2062 = vmatprep.subr.bf16.mxu1 %v5262_v47 }
  0xd7   :  { %2020 = vmatpush1.bf16.msra.mxu0 %v5212_v40 }
  0xd8   :  { %2021 = vmatprep.subr.bf16.mxu0 %v5217_v41  ;;  %2063 = vmatpush1.bf16.msra.mxu1 %v5260_v50 }
  0xd9   :  { %2064 = vmatprep.subr.bf16.mxu1 %v5265_v51 }
  0xdb   :  { %2022 = vmatpush1.bf16.msra.mxu0 %v5215_v44 }
  0xdc   :  { %2023 = vmatprep.subr.bf16.mxu0 %v5220_v45  ;;  %2065 = vmatpush1.bf16.msra.mxu1 %v5263_v55 }
  0xdd   :  { %2066 = vmatprep.subr.bf16.mxu1 %v5268_v56 }
  0xdf   :  { %2024 = vmatpush1.bf16.msra.mxu0 %v5218_v48 }
  0xe0   :  { %2025 = vmatprep.subr.bf16.mxu0 %v5223_v49  ;;  %2067 = vmatpush1.bf16.msra.mxu1 %v5266_v59 }
  0xe1   :  { %2068 = vmatprep.subr.bf16.mxu1 %v5271_v60 }
  0xe3   :  { %2026 = vmatpush1.bf16.msra.mxu0 %v5221_v52 }
  0xe4   :  { %2027 = vmatprep.subr.bf16.mxu0 %v5226_v53  ;;  %2069 = vmatpush1.bf16.msra.mxu1 %v5269_v63 }
  0xe5   :  { %2070 = vmatprep.subr.bf16.mxu1 %v5274_v0 }
  0xe7   :  { %2028 = vmatpush1.bf16.msra.mxu0 %v5224_v57 }
  0xe8   :  { %2029 = vmatprep.subr.bf16.mxu0 %v5229_v58  ;;  %2071 = vmatpush1.bf16.msra.mxu1 %v5272_v3 }
  0xe9   :  { %2072 = vmatprep.subr.bf16.mxu1 %v5277_v4 }
  0xeb   :  { %2030 = vmatpush2.bf16.msra.mxu0 %v5227_v61 }
  0xec   :  { %2031 = vmatprep.subr.bf16.mxu0 %v5232_v62  ;;  %2073 = vmatpush2.bf16.msra.mxu1 %v5275_v7 }
  0xed   :  { %2074 = vmatprep.subr.bf16.mxu1 %v5280_v8 }
  0xef   :  { %2032 = vmatpush2.bf16.msra.mxu0 %v5230_v1 }
  0xf0   :  { %2033 = vmatprep.subr.bf16.mxu0 %v5235_v2  ;;  %2075 = vmatpush2.bf16.msra.mxu1 %v5278_v11 }
  0xf1   :  { %2076 = vmatprep.subr.bf16.mxu1 %v5283_v14 }
  0xf3   :  { %2034 = vmatpush2.bf16.msra.mxu0 %v5233_v5 }
  0xf4   :  { %2035 = vmatprep.subr.bf16.mxu0 %v5238_v6  ;;  %2077 = vmatpush2.bf16.msra.mxu1 %v5281_v17  ;;  %v6629_v17 = vsub.s32 3, %v6614_v54 }
  0xf5   :  { %2078 = vmatprep.subr.bf16.mxu1 %v5286_v25 }
  0xf7   :  { %2036 = vmatpush2.bf16.msra.mxu0 %v5236_v9 }
  0xf8   :  { %2037 = vmatprep.subr.bf16.mxu0 %v5241_v10  ;;  %2079 = vmatpush2.bf16.msra.mxu1 %v5284_v27 }
  0xf9   :  { %2080 = vmatprep.subr.bf16.mxu1 %v5289_v28 }
  0xfb   :  { %2038 = vmatpush2.bf16.msra.mxu0 %v5239_v15 }
  0xfc   :  { %2039 = vmatprep.subr.bf16.mxu0 %v5244_v16  ;;  %2081 = vmatpush2.bf16.msra.mxu1 %v5287_v29 }
  0xfd   :  { %2082 = vmatprep.subr.bf16.mxu1 %v5292_v30 }
  0xff   :  { %2040 = vmatpush2.bf16.msra.mxu0 %v5242_v18  ;;  %v6632_v18 = vsub.s32 2, %v6614_v54 }
 0x100   :  { %2041 = vmatprep.subr.bf16.mxu0 %v5247_v19  ;;  %2083 = vmatpush2.bf16.msra.mxu1 %v5290_v31 }
 0x101   :  { %2084 = vmatprep.subr.bf16.mxu1 %v5295_v32  ;;  %v268_v25 = vrot.slane %v255_v12, %v6632_v18 }
 0x102   :  { %v1295_v38 = vpop.f32.mrf.mxu0 }
 0x103   :  { %2042 = vmatpush2.bf16.msra.mxu0 %v5245_v20  ;;  %v1338_v36 = vpop.f32.mrf.mxu1  ;;  %v1296_v47 = vadd.f32 %v1295_v38, %v260_v43 }
 0x104   :  { %2043 = vmatprep.subr.bf16.mxu0 %v5250_v22  ;;  %2085 = vmatpush2.bf16.msra.mxu1 %v5293_v33  ;;  %v1297_v40 = vpop.f32.mrf.mxu0 }
 0x105   :  { %2086 = vmatprep.subr.bf16.mxu1 %v5298_v34  ;;  %v1340_v13 = vpop.f32.mrf.mxu1  ;;  %v1298_v46 = vadd.f32 %v1297_v40, %v264_v42  ;;  %v1339_v55 = vadd.f32 %v1338_v36, %v1296_v47 }
 0x106   :  { %v1299_v44 = vpop.f32.mrf.mxu0 }
 0x107   :  { %2044 = vmatpush2.bf16.msra.mxu0 %v5248_v24  ;;  %v1342_v23 = vpop.f32.mrf.mxu1  ;;  %v1300_v49 = vadd.f32 %v1299_v44, %v260_v43  ;;  %v1341_v52 = vadd.f32 %v1340_v13, %v1298_v46  ;;  %v272_v24 = vrot.slane %v255_v12, %v6629_v17 }
 0x108   :  { %2087 = vmatpush2.bf16.msra.mxu1 %v5296_v35  ;;  %v1301_v48 = vpop.f32.mrf.mxu0 }
 0x109   :  { %v1344_v41 = vpop.f32.mrf.mxu1  ;;  %v1302_v53 = vadd.f32 %v1301_v48, %v264_v42  ;;  %v1343_v57 = vadd.f32 %v1342_v23, %v1300_v49 }
 0x10b   :  { %v1424_v45 = vpop.f32.mrf.mxu1  ;;  %v1345_v62 = vadd.f32 %v1344_v41, %v1302_v53 }
 0x10d   :  { %v1426_v50 = vpop.f32.mrf.mxu1 }
 0x10f   :  { %v1428_v59 = vpop.f32.mrf.mxu1 }
 0x111   :  { %v1430_v4 = vpop.f32.mrf.mxu1 }
 0x142   :  { %v1381_v51 = vpop.f32.mrf.mxu0 }
 0x143   :  { %v1382_v60 = vadd.f32 %v1381_v51, %v1339_v55 }
 0x144   :  { %v1383_v56 = vpop.f32.mrf.mxu0 }
 0x145   :  { %v1384_v58 = vadd.f32 %v1383_v56, %v1341_v52  ;;  %v1425_v5 = vadd.f32 %v1424_v45, %v1382_v60  ;;  %v5299_v60 = vld [vmem:[%s7506_s6 + $0xe0] ss:$16 sps:$4 sm:$0xff]  }
 0x146   :  { %v1385_v61 = vpop.f32.mrf.mxu0 }
 0x147   :  { %v1386_v63 = vadd.f32 %v1385_v61, %v1343_v57  ;;  %v1427_v1 = vadd.f32 %v1426_v50, %v1384_v58  ;;  %v1605_v10 = vmax.f32 %v1425_v5, 0.0  ;;  %v5302_v61 = vld [vmem:[%s7506_s6 + $0xe8] ss:$16 sps:$4 sm:$0xff]  }
 0x148   :  { %v1387_v0 = vpop.f32.mrf.mxu0  ;;  %v5314_v5 = vld [vmem:[%s7506_s6 + $0xa8] ss:$16 sps:$4 sm:$0xff]  }
 0x149   :  { %v1429_v2 = vadd.f32 %v1428_v59, %v1386_v63  ;;  %v1388_v3 = vadd.f32 %v1387_v0, %v1345_v62  ;;  %v1606_v8 = vmax.f32 %v1427_v1, 0.0  ;;  %v5301_v59 = vld [vmem:[%s7506_s6 + $0xe4] ss:$16 sps:$4 sm:$0xff]   ;;  %v5304_v62 = vld [vmem:[%s7506_s6 + $0xec] ss:$16 sps:$4 sm:$0xff]  }
 0x14a   :  { %2330 = vmatprep.subr.bf16.mxu0 %v5301_v59  ;;  %2373 = vmatprep.subr.bf16.mxu1 %v5304_v62  ;;  %v5310_v63 = vld [vmem:[%s7506_s6 + $0xcc] ss:$16 sps:$4 sm:$0xff]   ;;  %v5305_v0 = vld [vmem:[%s7506_s6 + $0xc0] ss:$16 sps:$4 sm:$0xff]   ;;  %v5308_v1 = vld [vmem:[%s7506_s6 + $0xc8] ss:$16 sps:$4 sm:$0xff]  }
 0x14b   :  { %v1431_v6 = vadd.f32 %v1430_v4, %v1388_v3  ;;  %v1609_v7 = vmax.f32 %v1429_v2, 0.0  ;;  %v1467_v15 = vpop.f32.mrf.mxu1  ;;  %v5313_v2 = vld [vmem:[%s7506_s6 + $0xa4] ss:$16 sps:$4 sm:$0xff]   ;;  %v5316_v3 = vld [vmem:[%s7506_s6 + $0xac] ss:$16 sps:$4 sm:$0xff]  }
 0x14c   :  { %v1468_v31 = vadd.f32 %v1467_v15, %v268_v25  ;;  %v5311_v4 = vld [vmem:[%s7506_s6 + $0xa0] ss:$16 sps:$4 sm:$0xff]   ;;  %v5331_v15 = vld [vmem:[%s7506_s6 + $0x44] ss:$16 sps:$4 sm:$0xff]   ;;  %v2104_v59 = vld [vmem:[%s7510_s1 + $0x8] sm:$0xff] }
 0x14d   :  { %v1610_v9 = vmax.f32 %v1431_v6, 0.0  ;;  %v1613_v14 = vpack.c.bf16 %v1609_v7, %v1605_v10  ;;  %v1469_v16 = vpop.f32.mrf.mxu1  ;;  %v5319_v6 = vld [vmem:[%s7506_s6 + $0x84] ss:$16 sps:$4 sm:$0xff]   ;;  %v5322_v7 = vld [vmem:[%s7506_s6 + $0x8c] ss:$16 sps:$4 sm:$0xff]  }
 0x14e   :  { %v1470_v30 = vadd.f32 %v1469_v16, %v272_v24  ;;  %v5325_v10 = vld [vmem:[%s7506_s6 + $0x64] ss:$16 sps:$4 sm:$0xff]   ;;  %v5326_v16 = vld [vmem:[%s7506_s6 + $0x68] ss:$16 sps:$4 sm:$0xff]  }
 0x14f   :  { %v1614_v11 = vpack.c.bf16 %v1610_v9, %v1606_v8  ;;  %v1471_v20 = vpop.f32.mrf.mxu1  ;;  %v5317_v8 = vld [vmem:[%s7506_s6 + $0x80] ss:$16 sps:$4 sm:$0xff]   ;;  %v5320_v9 = vld [vmem:[%s7506_s6 + $0x88] ss:$16 sps:$4 sm:$0xff]  }
 0x150   :  { %v1472_v34 = vadd.f32 %v1471_v20, %v268_v25  ;;  %v5329_v20 = vld [vmem:[%s7506_s6 + $0x40] ss:$16 sps:$4 sm:$0xff]   ;;  %v5340_v25 = vld [vmem:[%s7506_s6 + $0x2c] ss:$16 sps:$4 sm:$0xff]  }
 0x151   :  { %2045 = vmatprep.mubr.bf16.mxu0 %v1614_v11  ;;  %v1473_v28 = vpop.f32.mrf.mxu1  ;;  %v5323_v11 = vld [vmem:[%s7506_s6 + $0x60] ss:$16 sps:$4 sm:$0xff]  }
 0x152   :  { %2046 = vmatmul.mubr.bf16.vlgmr.msra.gmra.mxu0 %v1613_v14  ;;  %v1474_v38 = vadd.f32 %v1473_v28, %v272_v24  ;;  %v5328_v14 = vld [vmem:[%s7506_s6 + $0x6c] ss:$16 sps:$4 sm:$0xff]   ;;  %v5332_v24 = vld [vmem:[%s7506_s6 + $0x48] ss:$16 sps:$4 sm:$0xff]   ;;  %v5343_v28 = vld [vmem:[%s7506_s6 + $0x4] ss:$16 sps:$4 sm:$0xff]  }
 0x153   :  { %2362 = vmatprep.mubr.bf16.mxu0 %v5699_v21  ;;  %2331 = vmatpush1.bf16.msra.mxu0 %v5299_v60 }
 0x182   :  { %v1510_v19 = vpop.f32.mrf.mxu0 }
 0x183   :  { %v1511_v36 = vadd.f32 %v1510_v19, %v1468_v31  ;;  %v5334_v19 = vld [vmem:[%s7506_s6 + $0x4c] ss:$16 sps:$4 sm:$0xff]   ;;  %v5341_v31 = vld [vmem:[%s7506_s6] ss:$16 sps:$4 sm:$0xff]  }
 0x184   :  { %v1512_v22 = vpop.f32.mrf.mxu0 }
 0x185   :  { %v1513_v35 = vadd.f32 %v1512_v22, %v1470_v30  ;;  %v5337_v22 = vld [vmem:[%s7506_s6 + $0x24] ss:$16 sps:$4 sm:$0xff]   ;;  %v5346_v30 = vld [vmem:[%s7506_s6 + $0xc] ss:$16 sps:$4 sm:$0xff]  }
 0x186   :  { %v1514_v27 = vpop.f32.mrf.mxu0 }
 0x187   :  { %v1515_v23 = vadd.f32 %v1514_v27, %v1472_v34  ;;  %v5335_v27 = vld [vmem:[%s7506_s6 + $0x20] ss:$16 sps:$4 sm:$0xff]   ;;  %v5352_v34 = vld [vmem:[%s7507_s8 + $0x50c] ss:$28 sps:$4 sm:$0xff]  }
 0x188   :  { %v1516_v29 = vpop.f32.mrf.mxu0 }
 0x189   :  { %v1517_v44 = vadd.f32 %v1516_v29, %v1474_v38  ;;  %v5338_v29 = vld [vmem:[%s7506_s6 + $0x28] ss:$16 sps:$4 sm:$0xff]  }
 0x18a   :  { %v1596_v33 = vpop.f32.mrf.mxu0 }
 0x18b   :  { %v1553_v32 = vpop.f32.mrf.mxu1 }
 0x18c   :  { %v1598_v13 = vpop.f32.mrf.mxu0  ;;  %v1554_v41 = vadd.f32 %v1553_v32, %v1511_v36  ;;  %v5344_v32 = vld [vmem:[%s7506_s6 + $0x8] ss:$16 sps:$4 sm:$0xff]  }
 0x18d   :  { %v1555_v37 = vpop.f32.mrf.mxu1 }
 0x18e   :  { %v1556_v40 = vadd.f32 %v1555_v37, %v1513_v35  ;;  %v1600_v43 = vpop.f32.mrf.mxu0  ;;  %v1597_v50 = vadd.f32 %v1596_v33, %v1554_v41  ;;  %v5349_v33 = vld [vmem:[%s7507_s8 + $0x18c] ss:$28 sps:$4 sm:$0xff]   ;;  %v1681_v35 = vld [vmem:[%s7508_s5] sm:$0x3] }
 0x18f   :  { %v1557_v42 = vpop.f32.mrf.mxu1  ;;  %v1690_v38 = vrot.slane %v1681_v35, %v6617_v26 }
 0x190   :  { %v1558_v12 = vadd.f32 %v1557_v42, %v1515_v23  ;;  %v1602_v46 = vpop.f32.mrf.mxu0  ;;  %v1599_v47 = vadd.f32 %v1598_v13, %v1556_v40  ;;  %v1607_v56 = vmax.f32 %v1597_v50, 0.0  ;;  %v1686_v13 = vrot.slane %v1681_v35, %v6620_v39  ;;  %v5394_v35 = vld [vmem:[%s7507_s8 + $0x384] ss:$28 sps:$4 sm:$0xff]  }
 0x191   :  { %v1559_v45 = vpop.f32.mrf.mxu1 }
 0x192   :  { %v1601_v48 = vadd.f32 %v1600_v43, %v1558_v12  ;;  %v1560_v49 = vadd.f32 %v1559_v45, %v1517_v44  ;;  %v1608_v53 = vmax.f32 %v1599_v47, 0.0 }
 0x194   :  { %v1603_v51 = vadd.f32 %v1602_v46, %v1560_v49  ;;  %v1611_v52 = vmax.f32 %v1601_v48, 0.0 }
 0x196   :  { %v1612_v55 = vmax.f32 %v1603_v51, 0.0  ;;  %v1615_v58 = vpack.c.bf16 %v1611_v52, %v1607_v56 }
 0x198   :  { %v1616_v57 = vpack.c.bf16 %v1612_v55, %v1608_v53 }
 0x19a   :  { %2088 = vmatprep.mubr.bf16.mxu1 %v1616_v57 }
 0x19b   :  { %2089 = vmatmul.mubr.bf16.vlgmr.msra.gmra.mxu1 %v1615_v58  ;;  %v2103_v58 = vld [vmem:[%s7510_s1] sm:$0xff] }
 0x19c   :  { %2405 = vmatprep.mubr.bf16.mxu1 %v5699_v21  ;;  %v5307_v21 = vld [vmem:[%s7506_s6 + $0xc4] ss:$16 sps:$4 sm:$0xff]   ;;  %2374 = vmatpush1.bf16.msra.mxu1 %v5302_v61 }
 0x19d   :  { %2332 = vmatprep.subr.bf16.mxu0 %v5307_v21  ;;  %2375 = vmatprep.subr.bf16.mxu1 %v5310_v63 }
 0x19e   :  { %2333 = vmatpush1.bf16.msra.mxu0 %v5305_v0  ;;  %v5347_v0 = vld [vmem:[%s7507_s8 + $0x188] ss:$28 sps:$4 sm:$0xff]  }
 0x19f   :  { %2334 = vmatprep.subr.bf16.mxu0 %v5313_v2 }
 0x1a0   :  { %2376 = vmatpush1.bf16.msra.mxu1 %v5308_v1  ;;  %v5350_v1 = vld [vmem:[%s7507_s8 + $0x508] ss:$28 sps:$4 sm:$0xff]  }
 0x1a1   :  { %2377 = vmatprep.subr.bf16.mxu1 %v5316_v3  ;;  %v5355_v3 = vld [vmem:[%s7507_s8 + $0x154] ss:$28 sps:$4 sm:$0xff]  }
 0x1a2   :  { %2335 = vmatpush1.bf16.msra.mxu0 %v5311_v4  ;;  %v5358_v4 = vld [vmem:[%s7507_s8 + $0x4d4] ss:$28 sps:$4 sm:$0xff]  }
 0x1a3   :  { %2336 = vmatprep.subr.bf16.mxu0 %v5319_v6  ;;  %v5356_v6 = vld [vmem:[%s7507_s8 + $0x4d0] ss:$28 sps:$4 sm:$0xff]  }
 0x1a4   :  { %2378 = vmatpush1.bf16.msra.mxu1 %v5314_v5  ;;  %v5353_v5 = vld [vmem:[%s7507_s8 + $0x150] ss:$28 sps:$4 sm:$0xff]  }
 0x1a5   :  { %2379 = vmatprep.subr.bf16.mxu1 %v5322_v7  ;;  %v5361_v7 = vld [vmem:[%s7507_s8 + $0x11c] ss:$28 sps:$4 sm:$0xff]  }
 0x1a6   :  { %2337 = vmatpush1.bf16.msra.mxu0 %v5317_v8  ;;  %v5364_v8 = vld [vmem:[%s7507_s8 + $0x49c] ss:$28 sps:$4 sm:$0xff]  }
 0x1a7   :  { %2338 = vmatprep.subr.bf16.mxu0 %v5325_v10  ;;  %v5362_v10 = vld [vmem:[%s7507_s8 + $0x498] ss:$28 sps:$4 sm:$0xff]  }
 0x1a8   :  { %2380 = vmatpush1.bf16.msra.mxu1 %v5320_v9  ;;  %v5359_v9 = vld [vmem:[%s7507_s8 + $0x118] ss:$28 sps:$4 sm:$0xff]  }
 0x1a9   :  { %2381 = vmatprep.subr.bf16.mxu1 %v5328_v14  ;;  %v5370_v14 = vld [vmem:[%s7507_s8 + $0x464] ss:$28 sps:$4 sm:$0xff]  }
 0x1aa   :  { %2339 = vmatpush1.bf16.msra.mxu0 %v5323_v11  ;;  %v5367_v11 = vld [vmem:[%s7507_s8 + $0xe4] ss:$28 sps:$4 sm:$0xff]  }
 0x1ab   :  { %2340 = vmatprep.subr.bf16.mxu0 %v5331_v15  ;;  %v5365_v15 = vld [vmem:[%s7507_s8 + $0xe0] ss:$28 sps:$4 sm:$0xff]  }
 0x1ac   :  { %2382 = vmatpush1.bf16.msra.mxu1 %v5326_v16  ;;  %v5368_v16 = vld [vmem:[%s7507_s8 + $0x460] ss:$28 sps:$4 sm:$0xff]  }
 0x1ad   :  { %2383 = vmatprep.subr.bf16.mxu1 %v5334_v19  ;;  %v5373_v19 = vld [vmem:[%s7507_s8 + $0xac] ss:$28 sps:$4 sm:$0xff]  }
 0x1ae   :  { %2341 = vmatpush1.bf16.msra.mxu0 %v5329_v20  ;;  %v5376_v20 = vld [vmem:[%s7507_s8 + $0x42c] ss:$28 sps:$4 sm:$0xff]  }
 0x1af   :  { %2342 = vmatprep.subr.bf16.mxu0 %v5337_v22  ;;  %v5371_v22 = vld [vmem:[%s7507_s8 + $0xa8] ss:$28 sps:$4 sm:$0xff]  }
 0x1b0   :  { %2384 = vmatpush1.bf16.msra.mxu1 %v5332_v24  ;;  %v5374_v24 = vld [vmem:[%s7507_s8 + $0x428] ss:$28 sps:$4 sm:$0xff]  }
 0x1b1   :  { %2385 = vmatprep.subr.bf16.mxu1 %v5340_v25  ;;  %v5379_v25 = vld [vmem:[%s7507_s8 + $0x74] ss:$28 sps:$4 sm:$0xff]  }
 0x1b2   :  { %2343 = vmatpush1.bf16.msra.mxu0 %v5335_v27  ;;  %v5382_v27 = vld [vmem:[%s7507_s8 + $0x3f4] ss:$28 sps:$4 sm:$0xff]  }
 0x1b3   :  { %2344 = vmatprep.subr.bf16.mxu0 %v5343_v28  ;;  %v5377_v28 = vld [vmem:[%s7507_s8 + $0x70] ss:$28 sps:$4 sm:$0xff]  }
 0x1b4   :  { %2386 = vmatpush1.bf16.msra.mxu1 %v5338_v29  ;;  %v5380_v29 = vld [vmem:[%s7507_s8 + $0x3f0] ss:$28 sps:$4 sm:$0xff]  }
 0x1b5   :  { %2387 = vmatprep.subr.bf16.mxu1 %v5346_v30  ;;  %v5385_v30 = vld [vmem:[%s7507_s8 + $0x3c] ss:$28 sps:$4 sm:$0xff]  }
 0x1b6   :  { %2345 = vmatpush1.bf16.msra.mxu0 %v5341_v31  ;;  %v5388_v31 = vld [vmem:[%s7507_s8 + $0x3bc] ss:$28 sps:$4 sm:$0xff]  }
 0x1b7   :  { %3873 = vmatprep.subr.bf16.mxu0 %v5349_v33  ;;  %v5386_v33 = vld [vmem:[%s7507_s8 + $0x3b8] ss:$28 sps:$4 sm:$0xff]  }
 0x1b8   :  { %2388 = vmatpush1.bf16.msra.mxu1 %v5344_v32  ;;  %v5383_v32 = vld [vmem:[%s7507_s8 + $0x38] ss:$28 sps:$4 sm:$0xff]  }
 0x1b9   :  { %3916 = vmatprep.subr.bf16.mxu1 %v5352_v34  ;;  %v5391_v34 = vld [vmem:[%s7507_s8 + $0x4] ss:$28 sps:$4 sm:$0xff]  }
 0x212   :  { %v2047_v36 = vpop.f32.mrf.mxu0 }
 0x213   :  { %v2048_v40 = vadd.f32 %v2047_v36, %v1686_v13  ;;  %v5389_v36 = vld [vmem:[%s7507_s8] ss:$28 sps:$4 sm:$0xff]  }
 0x214   :  { %v2049_v37 = vpop.f32.mrf.mxu0 }
 0x215   :  { %v2050_v42 = vadd.f32 %v2049_v37, %v1690_v38  ;;  %v5392_v37 = vld [vmem:[%s7507_s8 + $0x380] ss:$28 sps:$4 sm:$0xff]  }
 0x216   :  { %v2051_v23 = vpop.f32.mrf.mxu0 }
 0x217   :  { %v2052_v45 = vadd.f32 %v2051_v23, %v1686_v13  ;;  %v5397_v13 = vld [vmem:[%s7507_s8 + $0x34c] ss:$28 sps:$4 sm:$0xff]  }
 0x218   :  { %v2053_v44 = vpop.f32.mrf.mxu0  ;;  %v5395_v23 = vld [vmem:[%s7507_s8 + $0x348] ss:$28 sps:$4 sm:$0xff]  }
 0x219   :  { %v2054_v48 = vadd.f32 %v2053_v44, %v1690_v38  ;;  %v5400_v38 = vld [vmem:[%s7507_s8 + $0x6cc] ss:$28 sps:$4 sm:$0xff]  }
 0x21a   :  { %v5404_v44 = vld [vmem:[%s7507_s8 + $0x690] ss:$28 sps:$4 sm:$0xff]  }
 0x25b   :  { %v2090_v41 = vpop.f32.mrf.mxu1 }
 0x25c   :  { %v2091_v43 = vadd.f32 %v2090_v41, %v2048_v40  ;;  %v5398_v40 = vld [vmem:[%s7507_s8 + $0x6c8] ss:$28 sps:$4 sm:$0xff]   ;;  %v5403_v41 = vld [vmem:[%s7507_s8 + $0x314] ss:$28 sps:$4 sm:$0xff]  }
 0x25d   :  { %v2092_v12 = vpop.f32.mrf.mxu1 }
 0x25e   :  { %2099 = vst [vmem:[%s7509_s11] sm:$0xff] %v2091_v43  ;;  %v2093_v46 = vadd.f32 %v2092_v12, %v2050_v42  ;;  %v5406_v42 = vld [vmem:[%s7507_s8 + $0x694] ss:$28 sps:$4 sm:$0xff]   ;;  %v5409_v12 = vld [vmem:[%s7507_s8 + $0x2dc] ss:$28 sps:$4 sm:$0xff]  }
 0x25f   :  { %v2094_v47 = vpop.f32.mrf.mxu1 }
 0x260   :  { %2100 = vst [vmem:[%s7509_s11 + $0x8] sm:$0xff] %v2093_v46  ;;  %v2105_v49 = vmul.f32 0.5, %v2093_v46  ;;  %v2095_v50 = vadd.f32 %v2094_v47, %v2052_v45  ;;  %v5412_v45 = vld [vmem:[%s7507_s8 + $0x65c] ss:$28 sps:$4 sm:$0xff]  }
 0x261   :  { %v2096_v51 = vpop.f32.mrf.mxu1  ;;  %v5407_v46 = vld [vmem:[%s7507_s8 + $0x2d8] ss:$28 sps:$4 sm:$0xff]  }
 0x262   :  { %v2107_v52 = vmul.f32 1.442695, %v2105_v49  ;;  %2101 = vst [vmem:[%s7509_s11 + $0x10] sm:$0xff] %v2095_v50  ;;  %v2097_v53 = vadd.f32 %v2096_v51, %v2054_v48  ;;  %v5410_v47 = vld [vmem:[%s7507_s8 + $0x658] ss:$28 sps:$4 sm:$0xff]  }
 0x263   :  { %v5415_v48 = vld [vmem:[%s7507_s8 + $0x2a4] ss:$28 sps:$4 sm:$0xff]  }
 0x264   :  { %5667 = vpow2.f32 %v2107_v52  ;;  %2102 = vst [vmem:[%s7509_s11 + $0x18] sm:$0xff] %v2097_v53  ;;  %v2106_v55 = vmul.f32 0.5, %v2097_v53  ;;  %v5418_v49 = vld [vmem:[%s7507_s8 + $0x624] ss:$28 sps:$4 sm:$0xff]   ;;  %v5421_v52 = vld [vmem:[%s7507_s8 + $0x26c] ss:$28 sps:$4 sm:$0xff]  }
 0x265   :  { %v5416_v51 = vld [vmem:[%s7507_s8 + $0x620] ss:$28 sps:$4 sm:$0xff]   ;;  %v5424_v53 = vld [vmem:[%s7507_s8 + $0x5ec] ss:$28 sps:$4 sm:$0xff]  }
 0x266   :  { %v2109_v56 = vmul.f32 1.442695, %v2106_v55  ;;  %v5419_v55 = vld [vmem:[%s7507_s8 + $0x268] ss:$28 sps:$4 sm:$0xff]  }
 0x268   :  { %5669 = vpow2.f32 %v2109_v56  ;;  %v5422_v56 = vld [vmem:[%s7507_s8 + $0x5e8] ss:$28 sps:$4 sm:$0xff]  }
 0x271   :  { %v5668_v57 = vpop.eup %5667 }
 0x272   :  { %v2111_v60 = vmul.f32 %v5668_v57, %v2103_v58  ;;  %v5427_v57 = vld [vmem:[%s7507_s8 + $0x234] ss:$28 sps:$4 sm:$0xff]  }
 0x273   :  { %v5430_v58 = vld [vmem:[%s7507_s8 + $0x5b4] ss:$28 sps:$4 sm:$0xff]  }
 0x274   :  { %v2113_v21 = vadd.f32 %v2111_v60, %v2091_v43  ;;  %v5401_v43 = vld [vmem:[%s7507_s8 + $0x310] ss:$28 sps:$4 sm:$0xff]  }
 0x275   :  { %v5670_v61 = vpop.eup %5669  ;;  %v5428_v60 = vld [vmem:[%s7507_s8 + $0x5b0] ss:$28 sps:$4 sm:$0xff]  }
 0x276   :  { %v2112_v62 = vmul.f32 %v5670_v61, %v2104_v59  ;;  %v5425_v59 = vld [vmem:[%s7507_s8 + $0x230] ss:$28 sps:$4 sm:$0xff]   ;;  %v5433_v61 = vld [vmem:[%s7507_s8 + $0x1fc] ss:$28 sps:$4 sm:$0xff]  }
 0x278   :  { %v2114_v63 = vadd.f32 %v2112_v62, %v2095_v50  ;;  %v5413_v50 = vld [vmem:[%s7507_s8 + $0x2a0] ss:$28 sps:$4 sm:$0xff]  }
 0x279   :  { %v5436_v62 = vld [vmem:[%s7507_s8 + $0x57c] ss:$28 sps:$4 sm:$0xff]  }
 0x27a   :  { %v2115_v2 = vpack.c.bf16 %v2114_v63, %v2113_v21  ;;  %v5431_v21 = vld [vmem:[%s7507_s8 + $0x1f8] ss:$28 sps:$4 sm:$0xff]  }
 0x27b   :  { %v5434_v63 = vld [vmem:[%s7507_s8 + $0x578] ss:$28 sps:$4 sm:$0xff]  }
 0x27c   :  { %2363 = vmatmul.mubr.bf16.vlgmr.msra.gmra.mxu0 %v2115_v2  ;;  %2406 = vmatmul.mubr.bf16.vlgmr.msra.gmra.mxu1 %v2115_v2  ;;  %v5437_v2 = vld [vmem:[%s7507_s8 + $0x1c0] ss:$28 sps:$4 sm:$0xff]  }
 0x27d   :  { %3874 = vmatpush1.bf16.msra.mxu0 %v5347_v0  ;;  %3917 = vmatpush1.bf16.msra.mxu1 %v5350_v1  ;;  %v5439_v0 = vld [vmem:[%s7507_s8 + $0x1c4] ss:$28 sps:$4 sm:$0xff]  }
 0x27e   :  { %3875 = vmatprep.subr.bf16.mxu0 %v5355_v3  ;;  %3918 = vmatprep.subr.bf16.mxu1 %v5358_v4  ;;  %v5442_v1 = vld [vmem:[%s7507_s8 + $0x544] ss:$28 sps:$4 sm:$0xff]   ;;  %v5445_v4 = vld [vmem:[%s7507_s8 + $0x194] ss:$28 sps:$4 sm:$0xff]  }
 0x27f   :  { %v5440_v3 = vld [vmem:[%s7507_s8 + $0x540] ss:$28 sps:$4 sm:$0xff]  }
 0x281   :  { %3876 = vmatpush1.bf16.msra.mxu0 %v5353_v5  ;;  %3919 = vmatpush1.bf16.msra.mxu1 %v5356_v6  ;;  %v5448_v5 = vld [vmem:[%s7507_s8 + $0x514] ss:$28 sps:$4 sm:$0xff]   ;;  %v2148_v6 = vld [vmem:[%s7511_s7] sm:$0xf] }
 0x282   :  { %3877 = vmatprep.subr.bf16.mxu0 %v5361_v7  ;;  %3920 = vmatprep.subr.bf16.mxu1 %v5364_v8 }
 0x285   :  { %3878 = vmatpush1.bf16.msra.mxu0 %v5359_v9  ;;  %3921 = vmatpush1.bf16.msra.mxu1 %v5362_v10  ;;  %v2157_v9 = vrot.slane %v2148_v6, %v6617_v26  ;;  %v2165_v10 = vrot.slane %v2148_v6, %v6629_v17 }
 0x286   :  { %3879 = vmatprep.subr.bf16.mxu0 %v5367_v11  ;;  %3922 = vmatprep.subr.bf16.mxu1 %v5370_v14  ;;  %v2153_v11 = vrot.slane %v2148_v6, %v6620_v39  ;;  %v2161_v14 = vrot.slane %v2148_v6, %v6632_v18  ;;  %v5487_v6 = vld [vmem:[%s7507_s8 + $0xc] ss:$28 sps:$4 sm:$0xff]  }
 0x289   :  { %3880 = vmatpush1.bf16.msra.mxu0 %v5365_v15  ;;  %3923 = vmatpush1.bf16.msra.mxu1 %v5368_v16 }
 0x28a   :  { %3881 = vmatprep.subr.bf16.mxu0 %v5373_v19  ;;  %3924 = vmatprep.subr.bf16.mxu1 %v5376_v20 }
 0x28d   :  { %3882 = vmatpush1.bf16.msra.mxu0 %v5371_v22  ;;  %3925 = vmatpush1.bf16.msra.mxu1 %v5374_v24 }
 0x28e   :  { %3883 = vmatprep.subr.bf16.mxu0 %v5379_v25  ;;  %3926 = vmatprep.subr.bf16.mxu1 %v5382_v27 }
 0x291   :  { %3884 = vmatpush1.bf16.msra.mxu0 %v5377_v28  ;;  %3927 = vmatpush1.bf16.msra.mxu1 %v5380_v29 }
 0x292   :  { %3885 = vmatprep.subr.bf16.mxu0 %v5385_v30  ;;  %3928 = vmatprep.subr.bf16.mxu1 %v5388_v31 }
 0x295   :  { %3886 = vmatpush1.bf16.msra.mxu0 %v5383_v32  ;;  %3929 = vmatpush1.bf16.msra.mxu1 %v5386_v33 }
 0x296   :  { %3887 = vmatprep.subr.bf16.mxu0 %v5391_v34  ;;  %3930 = vmatprep.subr.bf16.mxu1 %v5394_v35 }
 0x299   :  { %3888 = vmatpush1.bf16.msra.mxu0 %v5389_v36  ;;  %3931 = vmatpush1.bf16.msra.mxu1 %v5392_v37 }
 0x29a   :  { %3889 = vmatprep.subr.bf16.mxu0 %v5397_v13  ;;  %3932 = vmatprep.subr.bf16.mxu1 %v5400_v38 }
 0x29d   :  { %3890 = vmatpush2.bf16.msra.mxu0 %v5395_v23  ;;  %3933 = vmatpush2.bf16.msra.mxu1 %v5398_v40 }
 0x29e   :  { %3891 = vmatprep.subr.bf16.mxu0 %v5403_v41  ;;  %3934 = vmatprep.subr.bf16.mxu1 %v5406_v42 }
 0x2a1   :  { %3892 = vmatpush2.bf16.msra.mxu0 %v5401_v43  ;;  %3935 = vmatpush2.bf16.msra.mxu1 %v5404_v44  ;;  %v5443_v43 = vld [vmem:[%s7507_s8 + $0x190] ss:$28 sps:$4 sm:$0xff]  }
 0x2a2   :  { %3893 = vmatprep.subr.bf16.mxu0 %v5409_v12  ;;  %3936 = vmatprep.subr.bf16.mxu1 %v5412_v45  ;;  %v5446_v44 = vld [vmem:[%s7507_s8 + $0x510] ss:$28 sps:$4 sm:$0xff]  }
 0x2a5   :  { %3894 = vmatpush2.bf16.msra.mxu0 %v5407_v46  ;;  %3937 = vmatpush2.bf16.msra.mxu1 %v5410_v47  ;;  %v5451_v46 = vld [vmem:[%s7507_s8 + $0x15c] ss:$28 sps:$4 sm:$0xff]  }
 0x2a6   :  { %3895 = vmatprep.subr.bf16.mxu0 %v5415_v48  ;;  %3938 = vmatprep.subr.bf16.mxu1 %v5418_v49  ;;  %v5454_v47 = vld [vmem:[%s7507_s8 + $0x4dc] ss:$28 sps:$4 sm:$0xff]  }
 0x2a7   :  { %v5449_v48 = vld [vmem:[%s7507_s8 + $0x158] ss:$28 sps:$4 sm:$0xff]  }
 0x2a8   :  { %v5452_v49 = vld [vmem:[%s7507_s8 + $0x4d8] ss:$28 sps:$4 sm:$0xff]  }
 0x2a9   :  { %3896 = vmatpush2.bf16.msra.mxu0 %v5413_v50  ;;  %3939 = vmatpush2.bf16.msra.mxu1 %v5416_v51  ;;  %v5457_v50 = vld [vmem:[%s7507_s8 + $0x124] ss:$28 sps:$4 sm:$0xff]  }
 0x2aa   :  { %3897 = vmatprep.subr.bf16.mxu0 %v5421_v52  ;;  %3940 = vmatprep.subr.bf16.mxu1 %v5424_v53  ;;  %v5460_v51 = vld [vmem:[%s7507_s8 + $0x4a4] ss:$28 sps:$4 sm:$0xff]  }
 0x2ab   :  { %v5455_v52 = vld [vmem:[%s7507_s8 + $0x120] ss:$28 sps:$4 sm:$0xff]  }
 0x2ac   :  { %v5458_v53 = vld [vmem:[%s7507_s8 + $0x4a0] ss:$28 sps:$4 sm:$0xff]  }
 0x2ad   :  { %3898 = vmatpush2.bf16.msra.mxu0 %v5419_v55  ;;  %3941 = vmatpush2.bf16.msra.mxu1 %v5422_v56  ;;  %v5463_v55 = vld [vmem:[%s7507_s8 + $0xec] ss:$28 sps:$4 sm:$0xff]  }
 0x2ae   :  { %3899 = vmatprep.subr.bf16.mxu0 %v5427_v57  ;;  %3942 = vmatprep.subr.bf16.mxu1 %v5430_v58  ;;  %v5466_v56 = vld [vmem:[%s7507_s8 + $0x46c] ss:$28 sps:$4 sm:$0xff]  }
 0x2af   :  { %v5461_v57 = vld [vmem:[%s7507_s8 + $0xe8] ss:$28 sps:$4 sm:$0xff]  }
 0x2b0   :  { %v5464_v58 = vld [vmem:[%s7507_s8 + $0x468] ss:$28 sps:$4 sm:$0xff]  }
 0x2b1   :  { %3900 = vmatpush2.bf16.msra.mxu0 %v5425_v59  ;;  %3943 = vmatpush2.bf16.msra.mxu1 %v5428_v60  ;;  %v5469_v59 = vld [vmem:[%s7507_s8 + $0xb4] ss:$28 sps:$4 sm:$0xff]  }
 0x2b2   :  { %3901 = vmatprep.subr.bf16.mxu0 %v5433_v61  ;;  %3944 = vmatprep.subr.bf16.mxu1 %v5436_v62  ;;  %v5472_v60 = vld [vmem:[%s7507_s8 + $0x434] ss:$28 sps:$4 sm:$0xff]  }
 0x2b3   :  { %v5467_v61 = vld [vmem:[%s7507_s8 + $0xb0] ss:$28 sps:$4 sm:$0xff]  }
 0x2b4   :  { %v5470_v62 = vld [vmem:[%s7507_s8 + $0x430] ss:$28 sps:$4 sm:$0xff]  }
 0x2b5   :  { %3902 = vmatpush2.bf16.msra.mxu0 %v5431_v21  ;;  %3945 = vmatpush2.bf16.msra.mxu1 %v5434_v63  ;;  %v5475_v21 = vld [vmem:[%s7507_s8 + $0x7c] ss:$28 sps:$4 sm:$0xff]  }
 0x2b6   :  { %3903 = vmatprep.subr.bf16.mxu0 %v5439_v0  ;;  %3946 = vmatprep.subr.bf16.mxu1 %v5442_v1  ;;  %v5478_v63 = vld [vmem:[%s7507_s8 + $0x3fc] ss:$28 sps:$4 sm:$0xff]  }
 0x2b7   :  { %v5473_v0 = vld [vmem:[%s7507_s8 + $0x78] ss:$28 sps:$4 sm:$0xff]  }
 0x2b8   :  { %v5476_v1 = vld [vmem:[%s7507_s8 + $0x3f8] ss:$28 sps:$4 sm:$0xff]  }
 0x2b9   :  { %3904 = vmatpush2.bf16.msra.mxu0 %v5437_v2  ;;  %3947 = vmatpush2.bf16.msra.mxu1 %v5440_v3  ;;  %v5481_v2 = vld [vmem:[%s7507_s8 + $0x44] ss:$28 sps:$4 sm:$0xff]  }
 0x2ba   :  { %3959 = vmatprep.subr.bf16.mxu0 %v5445_v4  ;;  %4002 = vmatprep.subr.bf16.mxu1 %v5448_v5  ;;  %v5484_v3 = vld [vmem:[%s7507_s8 + $0x3c4] ss:$28 sps:$4 sm:$0xff]  }
 0x2bb   :  { %v5479_v4 = vld [vmem:[%s7507_s8 + $0x40] ss:$28 sps:$4 sm:$0xff]  }
 0x2bc   :  { %v5482_v5 = vld [vmem:[%s7507_s8 + $0x3c0] ss:$28 sps:$4 sm:$0xff]  }
 0x33c   :  { %v2364_v7 = vpop.f32.mrf.mxu0  ;;  %v2407_v8 = vpop.f32.mrf.mxu1 }
 0x33d   :  { %v2365_v28 = vadd.f32 %v2364_v7, %v2153_v11  ;;  %v2408_v29 = vadd.f32 %v2407_v8, %v2161_v14  ;;  %v5490_v7 = vld [vmem:[%s7507_s8 + $0x38c] ss:$28 sps:$4 sm:$0xff]  }
 0x33e   :  { %v2366_v15 = vpop.f32.mrf.mxu0  ;;  %v2409_v16 = vpop.f32.mrf.mxu1  ;;  %v5485_v8 = vld [vmem:[%s7507_s8 + $0x8] ss:$28 sps:$4 sm:$0xff]  }
 0x33f   :  { %v2367_v22 = vadd.f32 %v2366_v15, %v2157_v9  ;;  %v2410_v24 = vadd.f32 %v2409_v16, %v2165_v10  ;;  %v2416_v23 = vmax.f32 %v2365_v28, 0.0  ;;  %v2418_v40 = vmax.f32 %v2408_v29, 0.0  ;;  %v5494_v15 = vld [vmem:[%s7507_s8 + $0x6d0] ss:$28 sps:$4 sm:$0xff]   ;;  %v5499_v16 = vld [vmem:[%s7507_s8 + $0x31c] ss:$28 sps:$4 sm:$0xff]  }
 0x340   :  { %v2368_v19 = vpop.f32.mrf.mxu0  ;;  %v2411_v20 = vpop.f32.mrf.mxu1  ;;  %v5506_v28 = vld [vmem:[%s7507_s8 + $0x660] ss:$28 sps:$4 sm:$0xff]   ;;  %v5511_v29 = vld [vmem:[%s7507_s8 + $0x2ac] ss:$28 sps:$4 sm:$0xff]  }
 0x341   :  { %v2369_v25 = vadd.f32 %v2368_v19, %v2153_v11  ;;  %v2412_v27 = vadd.f32 %v2411_v20, %v2161_v14  ;;  %v2417_v36 = vmax.f32 %v2367_v22, 0.0  ;;  %v2419_v37 = vmax.f32 %v2410_v24, 0.0  ;;  %v5496_v11 = vld [vmem:[%s7507_s8 + $0x6d4] ss:$28 sps:$4 sm:$0xff]   ;;  %v5502_v19 = vld [vmem:[%s7507_s8 + $0x69c] ss:$28 sps:$4 sm:$0xff]  }
 0x342   :  { %v2370_v30 = vpop.f32.mrf.mxu0  ;;  %v2413_v31 = vpop.f32.mrf.mxu1  ;;  %v5491_v14 = vld [vmem:[%s7507_s8 + $0x350] ss:$28 sps:$4 sm:$0xff]   ;;  %v5497_v20 = vld [vmem:[%s7507_s8 + $0x318] ss:$28 sps:$4 sm:$0xff]   ;;  %v5505_v24 = vld [vmem:[%s7507_s8 + $0x2e4] ss:$28 sps:$4 sm:$0xff]  }
 0x343   :  { %v2371_v32 = vadd.f32 %v2370_v30, %v2157_v9  ;;  %v2414_v33 = vadd.f32 %v2413_v31, %v2165_v10  ;;  %v2420_v34 = vmax.f32 %v2369_v25, 0.0  ;;  %v2422_v35 = vmax.f32 %v2412_v27, 0.0  ;;  %v5488_v9 = vld [vmem:[%s7507_s8 + $0x388] ss:$28 sps:$4 sm:$0xff]   ;;  %v5493_v10 = vld [vmem:[%s7507_s8 + $0x354] ss:$28 sps:$4 sm:$0xff]  }
 0x344   :  { %v5500_v22 = vld [vmem:[%s7507_s8 + $0x698] ss:$28 sps:$4 sm:$0xff]   ;;  %v5508_v25 = vld [vmem:[%s7507_s8 + $0x664] ss:$28 sps:$4 sm:$0xff]   ;;  %v5514_v30 = vld [vmem:[%s7507_s8 + $0x62c] ss:$28 sps:$4 sm:$0xff]  }
 0x345   :  { %v2421_v13 = vmax.f32 %v2371_v32, 0.0  ;;  %v2423_v38 = vmax.f32 %v2414_v33, 0.0  ;;  %v6971_v12 = vpack.c.bf16 %v2420_v34, %v2416_v23  ;;  %v6973_v45 = vpack.c.bf16 %v2422_v35, %v2418_v40  ;;  %v5503_v27 = vld [vmem:[%s7507_s8 + $0x2e0] ss:$28 sps:$4 sm:$0xff]   ;;  %v5509_v31 = vld [vmem:[%s7507_s8 + $0x2a8] ss:$28 sps:$4 sm:$0xff]  }
 0x346   :  { %v5512_v32 = vld [vmem:[%s7507_s8 + $0x628] ss:$28 sps:$4 sm:$0xff]   ;;  %v5517_v33 = vld [vmem:[%s7507_s8 + $0x274] ss:$28 sps:$4 sm:$0xff]  }
 0x347   :  { %v6961_v41 = vpack.c.bf16 %v2421_v13, %v2417_v36  ;;  %v6963_v42 = vpack.c.bf16 %v2423_v38, %v2419_v37  ;;  %v5520_v34 = vld [vmem:[%s7507_s8 + $0x5f4] ss:$28 sps:$4 sm:$0xff]   ;;  %v5523_v37 = vld [vmem:[%s7507_s8 + $0x23c] ss:$28 sps:$4 sm:$0xff]   ;;  %v5529_v40 = vld [vmem:[%s7507_s8 + $0x204] ss:$28 sps:$4 sm:$0xff]  }
 0x348   :  { %v5515_v35 = vld [vmem:[%s7507_s8 + $0x270] ss:$28 sps:$4 sm:$0xff]   ;;  %v5526_v13 = vld [vmem:[%s7507_s8 + $0x5bc] ss:$28 sps:$4 sm:$0xff]  }
 0x349   :  { %3905 = vmatprep.mubr.bf16.mxu0 %v6961_v41  ;;  %3948 = vmatprep.mubr.bf16.mxu1 %v6963_v42  ;;  %v5518_v36 = vld [vmem:[%s7507_s8 + $0x5f0] ss:$28 sps:$4 sm:$0xff]   ;;  %v5521_v38 = vld [vmem:[%s7507_s8 + $0x238] ss:$28 sps:$4 sm:$0xff]  }
 0x34a   :  { %3906 = vmatmul.mubr.bf16.vlgmr.msra.gmra.mxu0 %v6971_v12  ;;  %3949 = vmatmul.mubr.bf16.vlgmr.msra.gmra.mxu1 %v6973_v45  ;;  %v5524_v23 = vld [vmem:[%s7507_s8 + $0x5b8] ss:$28 sps:$4 sm:$0xff]  }
 0x34b   :  { %3960 = vmatpush1.bf16.msra.mxu0 %v5443_v43  ;;  %4003 = vmatpush1.bf16.msra.mxu1 %v5446_v44  ;;  %v5532_v43 = vld [vmem:[%s7507_s8 + $0x584] ss:$28 sps:$4 sm:$0xff]  }
 0x34c   :  { %3991 = vmatprep.mubr.bf16.mxu0 %v6961_v41  ;;  %4034 = vmatprep.mubr.bf16.mxu1 %v6963_v42  ;;  %v5527_v44 = vld [vmem:[%s7507_s8 + $0x200] ss:$28 sps:$4 sm:$0xff]  }
 0x34d   :  { %3961 = vmatprep.subr.bf16.mxu0 %v5451_v46  ;;  %4004 = vmatprep.subr.bf16.mxu1 %v5454_v47  ;;  %v5530_v46 = vld [vmem:[%s7507_s8 + $0x580] ss:$28 sps:$4 sm:$0xff]   ;;  %v5535_v47 = vld [vmem:[%s7507_s8 + $0x1cc] ss:$28 sps:$4 sm:$0xff]  }
 0x34f   :  { %3962 = vmatpush1.bf16.msra.mxu0 %v5449_v48  ;;  %4005 = vmatpush1.bf16.msra.mxu1 %v5452_v49  ;;  %v5538_v48 = vld [vmem:[%s7507_s8 + $0x54c] ss:$28 sps:$4 sm:$0xff]  }
 0x350   :  { %3963 = vmatprep.subr.bf16.mxu0 %v5457_v50  ;;  %4006 = vmatprep.subr.bf16.mxu1 %v5460_v51  ;;  %v5533_v49 = vld [vmem:[%s7507_s8 + $0x1c8] ss:$28 sps:$4 sm:$0xff]   ;;  %v5541_v51 = vld [vmem:[%s7507_s8 + $0x19c] ss:$28 sps:$4 sm:$0xff]  }
 0x351   :  { %v5536_v50 = vld [vmem:[%s7507_s8 + $0x548] ss:$28 sps:$4 sm:$0xff]  }
 0x353   :  { %3964 = vmatpush1.bf16.msra.mxu0 %v5455_v52  ;;  %4007 = vmatpush1.bf16.msra.mxu1 %v5458_v53  ;;  %v5544_v52 = vld [vmem:[%s7507_s8 + $0x51c] ss:$28 sps:$4 sm:$0xff]  }
 0x354   :  { %3965 = vmatprep.subr.bf16.mxu0 %v5463_v55  ;;  %4008 = vmatprep.subr.bf16.mxu1 %v5466_v56  ;;  %v5539_v53 = vld [vmem:[%s7507_s8 + $0x198] ss:$28 sps:$4 sm:$0xff]   ;;  %v5547_v56 = vld [vmem:[%s7507_s8 + $0x164] ss:$28 sps:$4 sm:$0xff]  }
 0x355   :  { %v5542_v55 = vld [vmem:[%s7507_s8 + $0x518] ss:$28 sps:$4 sm:$0xff]  }
 0x357   :  { %3966 = vmatpush1.bf16.msra.mxu0 %v5461_v57  ;;  %4009 = vmatpush1.bf16.msra.mxu1 %v5464_v58  ;;  %v5550_v57 = vld [vmem:[%s7507_s8 + $0x4e4] ss:$28 sps:$4 sm:$0xff]  }
 0x358   :  { %3967 = vmatprep.subr.bf16.mxu0 %v5469_v59  ;;  %4010 = vmatprep.subr.bf16.mxu1 %v5472_v60  ;;  %v5545_v58 = vld [vmem:[%s7507_s8 + $0x160] ss:$28 sps:$4 sm:$0xff]   ;;  %v5553_v60 = vld [vmem:[%s7507_s8 + $0x12c] ss:$28 sps:$4 sm:$0xff]  }
 0x359   :  { %v5548_v59 = vld [vmem:[%s7507_s8 + $0x4e0] ss:$28 sps:$4 sm:$0xff]  }
 0x35b   :  { %3968 = vmatpush1.bf16.msra.mxu0 %v5467_v61  ;;  %4011 = vmatpush1.bf16.msra.mxu1 %v5470_v62  ;;  %v5556_v61 = vld [vmem:[%s7507_s8 + $0x4ac] ss:$28 sps:$4 sm:$0xff]  }
 0x35c   :  { %3969 = vmatprep.subr.bf16.mxu0 %v5475_v21  ;;  %4012 = vmatprep.subr.bf16.mxu1 %v5478_v63  ;;  %v5551_v62 = vld [vmem:[%s7507_s8 + $0x128] ss:$28 sps:$4 sm:$0xff]   ;;  %v5559_v63 = vld [vmem:[%s7507_s8 + $0xf4] ss:$28 sps:$4 sm:$0xff]  }
 0x35d   :  { %v5554_v21 = vld [vmem:[%s7507_s8 + $0x4a8] ss:$28 sps:$4 sm:$0xff]  }
 0x35f   :  { %3970 = vmatpush1.bf16.msra.mxu0 %v5473_v0  ;;  %4013 = vmatpush1.bf16.msra.mxu1 %v5476_v1  ;;  %v5562_v0 = vld [vmem:[%s7507_s8 + $0x474] ss:$28 sps:$4 sm:$0xff]  }
 0x360   :  { %3971 = vmatprep.subr.bf16.mxu0 %v5481_v2  ;;  %4014 = vmatprep.subr.bf16.mxu1 %v5484_v3  ;;  %v5557_v1 = vld [vmem:[%s7507_s8 + $0xf0] ss:$28 sps:$4 sm:$0xff]   ;;  %v5565_v3 = vld [vmem:[%s7507_s8 + $0xbc] ss:$28 sps:$4 sm:$0xff]  }
 0x361   :  { %v5560_v2 = vld [vmem:[%s7507_s8 + $0x470] ss:$28 sps:$4 sm:$0xff]  }
 0x363   :  { %3972 = vmatpush1.bf16.msra.mxu0 %v5479_v4  ;;  %4015 = vmatpush1.bf16.msra.mxu1 %v5482_v5  ;;  %v5568_v4 = vld [vmem:[%s7507_s8 + $0x43c] ss:$28 sps:$4 sm:$0xff]  }
 0x364   :  { %3973 = vmatprep.subr.bf16.mxu0 %v5487_v6  ;;  %4016 = vmatprep.subr.bf16.mxu1 %v5490_v7  ;;  %v5563_v5 = vld [vmem:[%s7507_s8 + $0xb8] ss:$28 sps:$4 sm:$0xff]   ;;  %v5571_v7 = vld [vmem:[%s7507_s8 + $0x84] ss:$28 sps:$4 sm:$0xff]  }
 0x365   :  { %v5566_v6 = vld [vmem:[%s7507_s8 + $0x438] ss:$28 sps:$4 sm:$0xff]  }
 0x367   :  { %3974 = vmatpush1.bf16.msra.mxu0 %v5485_v8  ;;  %4017 = vmatpush1.bf16.msra.mxu1 %v5488_v9  ;;  %v5574_v8 = vld [vmem:[%s7507_s8 + $0x404] ss:$28 sps:$4 sm:$0xff]  }
 0x368   :  { %3975 = vmatprep.subr.bf16.mxu0 %v5493_v10  ;;  %4018 = vmatprep.subr.bf16.mxu1 %v5496_v11  ;;  %v5569_v9 = vld [vmem:[%s7507_s8 + $0x80] ss:$28 sps:$4 sm:$0xff]   ;;  %v5577_v11 = vld [vmem:[%s7507_s8 + $0x4c] ss:$28 sps:$4 sm:$0xff]  }
 0x369   :  { %v5572_v10 = vld [vmem:[%s7507_s8 + $0x400] ss:$28 sps:$4 sm:$0xff]  }
 0x36b   :  { %3976 = vmatpush2.bf16.msra.mxu0 %v5491_v14  ;;  %4019 = vmatpush2.bf16.msra.mxu1 %v5494_v15  ;;  %v5580_v14 = vld [vmem:[%s7507_s8 + $0x3cc] ss:$28 sps:$4 sm:$0xff]  }
 0x36c   :  { %3977 = vmatprep.subr.bf16.mxu0 %v5499_v16  ;;  %4020 = vmatprep.subr.bf16.mxu1 %v5502_v19  ;;  %v5575_v15 = vld [vmem:[%s7507_s8 + $0x48] ss:$28 sps:$4 sm:$0xff]   ;;  %v5583_v19 = vld [vmem:[%s7507_s8 + $0x14] ss:$28 sps:$4 sm:$0xff]  }
 0x36d   :  { %v5578_v16 = vld [vmem:[%s7507_s8 + $0x3c8] ss:$28 sps:$4 sm:$0xff]  }
 0x36f   :  { %3978 = vmatpush2.bf16.msra.mxu0 %v5497_v20  ;;  %4021 = vmatpush2.bf16.msra.mxu1 %v5500_v22  ;;  %v5586_v20 = vld [vmem:[%s7507_s8 + $0x394] ss:$28 sps:$4 sm:$0xff]  }
 0x370   :  { %3979 = vmatprep.subr.bf16.mxu0 %v5505_v24  ;;  %4022 = vmatprep.subr.bf16.mxu1 %v5508_v25  ;;  %v5581_v22 = vld [vmem:[%s7507_s8 + $0x10] ss:$28 sps:$4 sm:$0xff]   ;;  %v5589_v25 = vld [vmem:[%s7507_s8 + $0x35c] ss:$28 sps:$4 sm:$0xff]  }
 0x371   :  { %v5584_v24 = vld [vmem:[%s7507_s8 + $0x390] ss:$28 sps:$4 sm:$0xff]  }
 0x373   :  { %3980 = vmatpush2.bf16.msra.mxu0 %v5503_v27  ;;  %4023 = vmatpush2.bf16.msra.mxu1 %v5506_v28  ;;  %v5592_v27 = vld [vmem:[%s7507_s8 + $0x6dc] ss:$28 sps:$4 sm:$0xff]  }
 0x374   :  { %3981 = vmatprep.subr.bf16.mxu0 %v5511_v29  ;;  %4024 = vmatprep.subr.bf16.mxu1 %v5514_v30  ;;  %v5587_v28 = vld [vmem:[%s7507_s8 + $0x358] ss:$28 sps:$4 sm:$0xff]   ;;  %v5595_v30 = vld [vmem:[%s7507_s8 + $0x324] ss:$28 sps:$4 sm:$0xff]  }
 0x375   :  { %v5590_v29 = vld [vmem:[%s7507_s8 + $0x6d8] ss:$28 sps:$4 sm:$0xff]  }
 0x377   :  { %3982 = vmatpush2.bf16.msra.mxu0 %v5509_v31  ;;  %4025 = vmatpush2.bf16.msra.mxu1 %v5512_v32  ;;  %v5598_v31 = vld [vmem:[%s7507_s8 + $0x6a4] ss:$28 sps:$4 sm:$0xff]  }
 0x378   :  { %3983 = vmatprep.subr.bf16.mxu0 %v5517_v33  ;;  %4026 = vmatprep.subr.bf16.mxu1 %v5520_v34  ;;  %v5593_v32 = vld [vmem:[%s7507_s8 + $0x320] ss:$28 sps:$4 sm:$0xff]   ;;  %v5601_v34 = vld [vmem:[%s7507_s8 + $0x2ec] ss:$28 sps:$4 sm:$0xff]  }
 0x379   :  { %v5596_v33 = vld [vmem:[%s7507_s8 + $0x6a0] ss:$28 sps:$4 sm:$0xff]  }
 0x37b   :  { %3984 = vmatpush2.bf16.msra.mxu0 %v5515_v35  ;;  %4027 = vmatpush2.bf16.msra.mxu1 %v5518_v36  ;;  %v5604_v35 = vld [vmem:[%s7507_s8 + $0x66c] ss:$28 sps:$4 sm:$0xff]  }
 0x37c   :  { %3985 = vmatprep.subr.bf16.mxu0 %v5523_v37  ;;  %4028 = vmatprep.subr.bf16.mxu1 %v5526_v13  ;;  %v5599_v36 = vld [vmem:[%s7507_s8 + $0x2e8] ss:$28 sps:$4 sm:$0xff]   ;;  %v5607_v13 = vld [vmem:[%s7507_s8 + $0x2b4] ss:$28 sps:$4 sm:$0xff]  }
 0x37d   :  { %v5602_v37 = vld [vmem:[%s7507_s8 + $0x668] ss:$28 sps:$4 sm:$0xff]  }
 0x37f   :  { %3986 = vmatpush2.bf16.msra.mxu0 %v5521_v38  ;;  %4029 = vmatpush2.bf16.msra.mxu1 %v5524_v23  ;;  %v5610_v38 = vld [vmem:[%s7507_s8 + $0x634] ss:$28 sps:$4 sm:$0xff]  }
 0x380   :  { %3987 = vmatprep.subr.bf16.mxu0 %v5529_v40  ;;  %4030 = vmatprep.subr.bf16.mxu1 %v5532_v43  ;;  %v5605_v23 = vld [vmem:[%s7507_s8 + $0x2b0] ss:$28 sps:$4 sm:$0xff]   ;;  %v5613_v43 = vld [vmem:[%s7507_s8 + $0x27c] ss:$28 sps:$4 sm:$0xff]  }
 0x381   :  { %v5608_v40 = vld [vmem:[%s7507_s8 + $0x630] ss:$28 sps:$4 sm:$0xff]  }
 0x383   :  { %3988 = vmatpush2.bf16.msra.mxu0 %v5527_v44  ;;  %4031 = vmatpush2.bf16.msra.mxu1 %v5530_v46  ;;  %v5616_v44 = vld [vmem:[%s7507_s8 + $0x5fc] ss:$28 sps:$4 sm:$0xff]  }
 0x384   :  { %3989 = vmatprep.subr.bf16.mxu0 %v5535_v47  ;;  %4032 = vmatprep.subr.bf16.mxu1 %v5538_v48  ;;  %v5611_v46 = vld [vmem:[%s7507_s8 + $0x278] ss:$28 sps:$4 sm:$0xff]   ;;  %v5619_v48 = vld [vmem:[%s7507_s8 + $0x244] ss:$28 sps:$4 sm:$0xff]  }
 0x385   :  { %v5614_v47 = vld [vmem:[%s7507_s8 + $0x5f8] ss:$28 sps:$4 sm:$0xff]  }
 0x387   :  { %3990 = vmatpush2.bf16.msra.mxu0 %v5533_v49  ;;  %4033 = vmatpush2.bf16.msra.mxu1 %v5536_v50  ;;  %v5622_v49 = vld [vmem:[%s7507_s8 + $0x5c4] ss:$28 sps:$4 sm:$0xff]  }
 0x388   :  { %4045 = vmatprep.subr.bf16.mxu0 %v5541_v51  ;;  %4088 = vmatprep.subr.bf16.mxu1 %v5544_v52  ;;  %v5617_v50 = vld [vmem:[%s7507_s8 + $0x240] ss:$28 sps:$4 sm:$0xff]   ;;  %v5625_v52 = vld [vmem:[%s7507_s8 + $0x20c] ss:$28 sps:$4 sm:$0xff]  }
 0x389   :  { %v5620_v51 = vld [vmem:[%s7507_s8 + $0x5c0] ss:$28 sps:$4 sm:$0xff]  }
 0x38a   :  { %3992 = vmatmul.mubr.bf16.vlgmr.msra.gmra.mxu0 %v6971_v12  ;;  %4035 = vmatmul.mubr.bf16.vlgmr.msra.gmra.mxu1 %v6973_v45 }
 0x38b   :  { %4046 = vmatpush1.bf16.msra.mxu0 %v5539_v53  ;;  %4077 = vmatprep.mubr.bf16.mxu0 %v6961_v41  ;;  %v5628_v53 = vld [vmem:[%s7507_s8 + $0x58c] ss:$28 sps:$4 sm:$0xff]  }
 0x38c   :  { %4089 = vmatpush1.bf16.msra.mxu1 %v5542_v55  ;;  %4120 = vmatprep.mubr.bf16.mxu1 %v6963_v42  ;;  %v5623_v55 = vld [vmem:[%s7507_s8 + $0x208] ss:$28 sps:$4 sm:$0xff]  }
 0x38d   :  { %4047 = vmatprep.subr.bf16.mxu0 %v5547_v56  ;;  %4090 = vmatprep.subr.bf16.mxu1 %v5550_v57  ;;  %v5626_v56 = vld [vmem:[%s7507_s8 + $0x588] ss:$28 sps:$4 sm:$0xff]   ;;  %v5631_v57 = vld [vmem:[%s7507_s8 + $0x1d4] ss:$28 sps:$4 sm:$0xff]  }
 0x38f   :  { %4048 = vmatpush1.bf16.msra.mxu0 %v5545_v58  ;;  %v5634_v58 = vld [vmem:[%s7507_s8 + $0x554] ss:$28 sps:$4 sm:$0xff]  }
 0x390   :  { %4091 = vmatpush1.bf16.msra.mxu1 %v5548_v59  ;;  %4049 = vmatprep.subr.bf16.mxu0 %v5553_v60  ;;  %v5629_v59 = vld [vmem:[%s7507_s8 + $0x1d0] ss:$28 sps:$4 sm:$0xff]  }
 0x391   :  { %4092 = vmatprep.subr.bf16.mxu1 %v5556_v61  ;;  %v5632_v60 = vld [vmem:[%s7507_s8 + $0x550] ss:$28 sps:$4 sm:$0xff]   ;;  %v5635_v61 = vld [vmem:[%s7507_s8 + $0x360] ss:$28 sps:$4 sm:$0xff]  }
 0x393   :  { %4050 = vmatpush1.bf16.msra.mxu0 %v5551_v62  ;;  %v5636_v62 = vld [vmem:[%s7507_s8 + $0x6e0] ss:$28 sps:$4 sm:$0xff]  }
 0x394   :  { %4093 = vmatpush1.bf16.msra.mxu1 %v5554_v21  ;;  %4051 = vmatprep.subr.bf16.mxu0 %v5559_v63  ;;  %v5637_v21 = vld [vmem:[%s7507_s8 + $0x1a0] ss:$28 sps:$4 sm:$0xff]  }
 0x395   :  { %4094 = vmatprep.subr.bf16.mxu1 %v5562_v0  ;;  %v5638_v63 = vld [vmem:[%s7507_s8 + $0x520] ss:$28 sps:$4 sm:$0xff]   ;;  %v5639_v0 = vld [vmem:[%s7507_s8 + $0x328] ss:$28 sps:$4 sm:$0xff]  }
 0x397   :  { %4052 = vmatpush1.bf16.msra.mxu0 %v5557_v1  ;;  %v5640_v1 = vld [vmem:[%s7507_s8 + $0x6a8] ss:$28 sps:$4 sm:$0xff]  }
 0x398   :  { %4095 = vmatpush1.bf16.msra.mxu1 %v5560_v2  ;;  %4053 = vmatprep.subr.bf16.mxu0 %v5565_v3  ;;  %v5641_v2 = vld [vmem:[%s7507_s8 + $0x168] ss:$28 sps:$4 sm:$0xff]  }
 0x399   :  { %4096 = vmatprep.subr.bf16.mxu1 %v5568_v4  ;;  %v5642_v3 = vld [vmem:[%s7507_s8 + $0x4e8] ss:$28 sps:$4 sm:$0xff]   ;;  %v5643_v4 = vld [vmem:[%s7507_s8 + $0x2f0] ss:$28 sps:$4 sm:$0xff]  }
 0x39b   :  { %4054 = vmatpush1.bf16.msra.mxu0 %v5563_v5  ;;  %v5644_v5 = vld [vmem:[%s7507_s8 + $0x670] ss:$28 sps:$4 sm:$0xff]  }
 0x39c   :  { %4097 = vmatpush1.bf16.msra.mxu1 %v5566_v6  ;;  %4055 = vmatprep.subr.bf16.mxu0 %v5571_v7  ;;  %v5646_v6 = vld [vmem:[%s7507_s8 + $0x4b0] ss:$28 sps:$4 sm:$0xff]   ;;  %v5648_v7 = vld [vmem:[%s7507_s8 + $0x638] ss:$28 sps:$4 sm:$0xff]  }
 0x39d   :  { %4098 = vmatprep.subr.bf16.mxu1 %v5574_v8  ;;  %v5649_v8 = vld [vmem:[%s7507_s8 + $0xf8] ss:$28 sps:$4 sm:$0xff]  }
 0x39f   :  { %4056 = vmatpush1.bf16.msra.mxu0 %v5569_v9  ;;  %v5650_v9 = vld [vmem:[%s7507_s8 + $0x478] ss:$28 sps:$4 sm:$0xff]  }
 0x3a0   :  { %4099 = vmatpush1.bf16.msra.mxu1 %v5572_v10  ;;  %4057 = vmatprep.subr.bf16.mxu0 %v5577_v11  ;;  %v5651_v10 = vld [vmem:[%s7507_s8 + $0x280] ss:$28 sps:$4 sm:$0xff]  }
 0x3a1   :  { %4100 = vmatprep.subr.bf16.mxu1 %v5580_v14  ;;  %v5652_v11 = vld [vmem:[%s7507_s8 + $0x600] ss:$28 sps:$4 sm:$0xff]  }
 0x3a2   :  { %v5653_v14 = vld [vmem:[%s7507_s8 + $0xc0] ss:$28 sps:$4 sm:$0xff]  }
 0x3a3   :  { %4058 = vmatpush1.bf16.msra.mxu0 %v5575_v15  ;;  %v5654_v15 = vld [vmem:[%s7507_s8 + $0x440] ss:$28 sps:$4 sm:$0xff]  }
 0x3a4   :  { %4101 = vmatpush1.bf16.msra.mxu1 %v5578_v16  ;;  %4059 = vmatprep.subr.bf16.mxu0 %v5583_v19  ;;  %v5655_v16 = vld [vmem:[%s7507_s8 + $0x248] ss:$28 sps:$4 sm:$0xff]  }
 0x3a5   :  { %4102 = vmatprep.subr.bf16.mxu1 %v5586_v20  ;;  %v5656_v19 = vld [vmem:[%s7507_s8 + $0x5c8] ss:$28 sps:$4 sm:$0xff]  }
 0x3a6   :  { %v5657_v20 = vld [vmem:[%s7507_s8 + $0x88] ss:$28 sps:$4 sm:$0xff]  }
 0x3a7   :  { %4060 = vmatpush1.bf16.msra.mxu0 %v5581_v22  ;;  %v5658_v22 = vld [vmem:[%s7507_s8 + $0x408] ss:$28 sps:$4 sm:$0xff]  }
 0x3a8   :  { %4103 = vmatpush1.bf16.msra.mxu1 %v5584_v24  ;;  %4061 = vmatprep.subr.bf16.mxu0 %v5589_v25  ;;  %v5659_v24 = vld [vmem:[%s7507_s8 + $0x210] ss:$28 sps:$4 sm:$0xff]  }
 0x3a9   :  { %4104 = vmatprep.subr.bf16.mxu1 %v5592_v27  ;;  %v5660_v25 = vld [vmem:[%s7507_s8 + $0x590] ss:$28 sps:$4 sm:$0xff]  }
 0x3aa   :  { %v5661_v27 = vld [vmem:[%s7507_s8 + $0x50] ss:$28 sps:$4 sm:$0xff]  }
 0x3ab   :  { %4062 = vmatpush2.bf16.msra.mxu0 %v5587_v28  ;;  %v5662_v28 = vld [vmem:[%s7507_s8 + $0x3d0] ss:$28 sps:$4 sm:$0xff]  }
 0x3ac   :  { %4105 = vmatpush2.bf16.msra.mxu1 %v5590_v29  ;;  %4063 = vmatprep.subr.bf16.mxu0 %v5595_v30  ;;  %v5663_v29 = vld [vmem:[%s7507_s8 + $0x1d8] ss:$28 sps:$4 sm:$0xff]  }
 0x3ad   :  { %4106 = vmatprep.subr.bf16.mxu1 %v5598_v31  ;;  %v5664_v30 = vld [vmem:[%s7507_s8 + $0x558] ss:$28 sps:$4 sm:$0xff]  }
 0x3ae   :  { %v5665_v31 = vld [vmem:[%s7507_s8 + $0x18] ss:$28 sps:$4 sm:$0xff]  }
 0x3af   :  { %4064 = vmatpush2.bf16.msra.mxu0 %v5593_v32  ;;  %v5666_v32 = vld [vmem:[%s7507_s8 + $0x398] ss:$28 sps:$4 sm:$0xff]  }
 0x3b0   :  { %4107 = vmatpush2.bf16.msra.mxu1 %v5596_v33  ;;  %4065 = vmatprep.subr.bf16.mxu0 %v5601_v34  ;;  %v7462_v33 = vld [vmem:[%s7512_s9] sm:$0x7f] }
 0x3b1   :  { %4108 = vmatprep.subr.bf16.mxu1 %v5604_v35  ;;  %v2689_v34 = vrot.slane %v7462_v33, %v6620_v39  ;;  %v2693_v35 = vrot.slane %v7462_v33, %v6617_v26 }
 0x3b3   :  { %4066 = vmatpush2.bf16.msra.mxu0 %v5599_v36 }
 0x3b4   :  { %4109 = vmatpush2.bf16.msra.mxu1 %v5602_v37  ;;  %4067 = vmatprep.subr.bf16.mxu0 %v5607_v13 }
 0x3b5   :  { %4110 = vmatprep.subr.bf16.mxu1 %v5610_v38 }
 0x3b7   :  { %4068 = vmatpush2.bf16.msra.mxu0 %v5605_v23 }
 0x3b8   :  { %4111 = vmatpush2.bf16.msra.mxu1 %v5608_v40  ;;  %4069 = vmatprep.subr.bf16.mxu0 %v5613_v43 }
 0x3b9   :  { %4112 = vmatprep.subr.bf16.mxu1 %v5616_v44 }
 0x3bb   :  { %4070 = vmatpush2.bf16.msra.mxu0 %v5611_v46 }
 0x3bc   :  { %4113 = vmatpush2.bf16.msra.mxu1 %v5614_v47  ;;  %4071 = vmatprep.subr.bf16.mxu0 %v5619_v48 }
 0x3bd   :  { %4114 = vmatprep.subr.bf16.mxu1 %v5622_v49 }
 0x3bf   :  { %4072 = vmatpush2.bf16.msra.mxu0 %v5617_v50 }
 0x3c0   :  { %4115 = vmatpush2.bf16.msra.mxu1 %v5620_v51  ;;  %4073 = vmatprep.subr.bf16.mxu0 %v5625_v52 }
 0x3c1   :  { %4116 = vmatprep.subr.bf16.mxu1 %v5628_v53 }
 0x3c3   :  { %4074 = vmatpush2.bf16.msra.mxu0 %v5623_v55 }
 0x3c4   :  { %4117 = vmatpush2.bf16.msra.mxu1 %v5626_v56  ;;  %4075 = vmatprep.subr.bf16.mxu0 %v5631_v57 }
 0x3c5   :  { %4118 = vmatprep.subr.bf16.mxu1 %v5634_v58 }
 0x3c7   :  { %4076 = vmatpush2.bf16.msra.mxu0 %v5629_v59 }
 0x3c8   :  { %4119 = vmatpush2.bf16.msra.mxu1 %v5632_v60  ;;  %4864 = vmatprep.subr.bf16.mxu0 %v5635_v61 }
 0x3c9   :  { %4886 = vmatprep.subr.bf16.mxu1 %v5636_v62 }
 0x3ca   :  { %4078 = vmatmul.mubr.bf16.vlgmr.msra.gmra.mxu0 %v6971_v12 }
 0x3cb   :  { %4121 = vmatmul.mubr.bf16.vlgmr.msra.gmra.mxu1 %v6973_v45  ;;  %4865 = vmatpush3.bf16.msra.mxu0 %v5637_v21 }
 0x3cc   :  { %4163 = vmatprep.mubr.bf16.mxu0 %v6961_v41  ;;  %4887 = vmatpush3.bf16.msra.mxu1 %v5638_v63  ;;  %v5645_v41 = vld [vmem:[%s7507_s8 + $0x130] ss:$28 sps:$4 sm:$0xff]  }
 0x3cd   :  { %4204 = vmatprep.mubr.bf16.mxu1 %v6963_v42  ;;  %4866 = vmatprep.subr.bf16.mxu0 %v5639_v0  ;;  %v5647_v42 = vld [vmem:[%s7507_s8 + $0x2b8] ss:$28 sps:$4 sm:$0xff]  }
 0x3ce   :  { %4888 = vmatprep.subr.bf16.mxu1 %v5640_v1 }
 0x3cf   :  { %4867 = vmatpush3.bf16.msra.mxu0 %v5641_v2 }
 0x3d0   :  { %4889 = vmatpush3.bf16.msra.mxu1 %v5642_v3  ;;  %4868 = vmatprep.subr.bf16.mxu0 %v5643_v4  ;;  %v2697_v4 = vrot.slane %v7462_v33, %v6632_v18 }
 0x3d1   :  { %4890 = vmatprep.subr.bf16.mxu1 %v5644_v5  ;;  %v2701_v5 = vrot.slane %v7462_v33, %v6629_v17 }
 0x3d3   :  { %4869 = vmatpush3.bf16.msra.mxu0 %v5645_v41 }
 0x3d4   :  { %4891 = vmatpush3.bf16.msra.mxu1 %v5646_v6  ;;  %4870 = vmatprep.subr.bf16.mxu0 %v5647_v42 }
 0x3d5   :  { %4892 = vmatprep.subr.bf16.mxu1 %v5648_v7 }
 0x3d7   :  { %4871 = vmatpush3.bf16.msra.mxu0 %v5649_v8 }
 0x3d8   :  { %4893 = vmatpush3.bf16.msra.mxu1 %v5650_v9  ;;  %4872 = vmatprep.subr.bf16.mxu0 %v5651_v10 }
 0x3d9   :  { %4894 = vmatprep.subr.bf16.mxu1 %v5652_v11 }
 0x3db   :  { %4873 = vmatpush3.bf16.msra.mxu0 %v5653_v14 }
 0x3dc   :  { %4895 = vmatpush3.bf16.msra.mxu1 %v5654_v15  ;;  %4874 = vmatprep.subr.bf16.mxu0 %v5655_v16 }
 0x3dd   :  { %4896 = vmatprep.subr.bf16.mxu1 %v5656_v19 }
 0x3df   :  { %4875 = vmatpush3.bf16.msra.mxu0 %v5657_v20 }
 0x3e0   :  { %4897 = vmatpush3.bf16.msra.mxu1 %v5658_v22  ;;  %4876 = vmatprep.subr.bf16.mxu0 %v5659_v24 }
 0x3e1   :  { %4898 = vmatprep.subr.bf16.mxu1 %v5660_v25 }
 0x3e3   :  { %4877 = vmatpush3.bf16.msra.mxu0 %v5661_v27 }
 0x3e4   :  { %4899 = vmatpush3.bf16.msra.mxu1 %v5662_v28  ;;  %4878 = vmatprep.subr.bf16.mxu0 %v5663_v29 }
 0x3e5   :  { %4900 = vmatprep.subr.bf16.mxu1 %v5664_v30 }
 0x3e7   :  { %4879 = vmatpush3.bf16.msra.mxu0 %v5665_v31 }
 0x3e8   :  { %4901 = vmatpush3.bf16.msra.mxu1 %v5666_v32 }
 0x3ea   :  { %4164 = vmatmul.mubr.bf16.vlgmr.msra.gmra.mxu0 %v6971_v12 }
 0x3eb   :  { %4205 = vmatmul.mubr.bf16.vlgmr.msra.gmra.mxu1 %v6973_v45 }
 0x40a   :  { %v3907_v36 = vpop.f32.mrf.mxu0  ;;  %v3950_v37 = vpop.f32.mrf.mxu1 }
 0x40b   :  { %v3908_v13 = vadd.f32 %v3907_v36, %v2689_v34 }
 0x40c   :  { %v3909_v38 = vpop.f32.mrf.mxu0  ;;  %v3952_v23 = vpop.f32.mrf.mxu1 }
 0x40d   :  { %v3951_v40 = vadd.f32 %v3950_v37, %v3908_v13  ;;  %v3910_v12 = vadd.f32 %v3909_v38, %v2693_v35 }
 0x40e   :  { %v3911_v43 = vpop.f32.mrf.mxu0  ;;  %v3954_v45 = vpop.f32.mrf.mxu1 }
 0x40f   :  { %v4213_v44 = vmul.f32 0.5, %v3951_v40  ;;  %v3953_v46 = vadd.f32 %v3952_v23, %v3910_v12  ;;  %v3912_v47 = vadd.f32 %v3911_v43, %v2689_v34 }
 0x410   :  { %v3913_v48 = vpop.f32.mrf.mxu0  ;;  %v3956_v51 = vpop.f32.mrf.mxu1 }
 0x411   :  { %5671 = vtanh.f32 %v4213_v44  ;;  %v4214_v49 = vmul.f32 0.5, %v3953_v46  ;;  %v3955_v50 = vadd.f32 %v3954_v45, %v3912_v47  ;;  %v3914_v39 = vadd.f32 %v3913_v48, %v2693_v35 }
 0x412   :  { %v2704_v45 = vsub.s32 4, %v6614_v54  ;;  %v2708_v44 = vsub.s32 5, %v6614_v54 }
 0x413   :  { %5673 = vtanh.f32 %v4214_v49  ;;  %v4220_v26 = vmul.f32 0.5, %v3955_v50  ;;  %v3957_v52 = vadd.f32 %v3956_v51, %v3914_v39 }
 0x414   :  { %v2705_v46 = vrot.slane %v7462_v33, %v2704_v45  ;;  %v2709_v47 = vrot.slane %v7462_v33, %v2708_v44 }
 0x415   :  { %5675 = vtanh.f32 %v4220_v26  ;;  %v4221_v53 = vmul.f32 0.5, %v3957_v52 }
 0x417   :  { %5677 = vtanh.f32 %v4221_v53 }
 0x41e   :  { %v5672_v55 = vpop.eup %5671 }
 0x41f   :  { %v4241_v56 = vmul.f32 0.5, %v5672_v55 }
 0x420   :  { %v5674_v57 = vpop.eup %5673 }
 0x421   :  { %v4242_v58 = vmul.f32 0.5, %v5674_v57  ;;  %v4255_v60 = vadd.f32 0.5, %v4241_v56 }
 0x422   :  { %v5676_v59 = vpop.eup %5675 }
 0x423   :  { %v4256_v61 = vadd.f32 0.5, %v4242_v58  ;;  %v4248_v62 = vmul.f32 0.5, %v5676_v59 }
 0x424   :  { %v5678_v21 = vpop.eup %5677 }
 0x425   :  { %v4856_v63 = vpack.c.bf16 %v4256_v61, %v4255_v60  ;;  %v4249_v0 = vmul.f32 0.5, %v5678_v21  ;;  %v4262_v1 = vadd.f32 0.5, %v4248_v62 }
 0x427   :  { %4313 = vst [vmem:[%s7513_s10] sm:$0xff] %v4856_v63  ;;  %v4263_v2 = vadd.f32 0.5, %v4249_v0 }
 0x429   :  { %v4860_v3 = vpack.c.bf16 %v4263_v2, %v4262_v1 }
 0x42b   :  { %4318 = vst [vmem:[%s7513_s10 + $0x1c] sm:$0xff] %v4860_v3 }
 0x44a   :  { %v3993_v41 = vpop.f32.mrf.mxu0  ;;  %v4036_v6 = vpop.f32.mrf.mxu1 }
 0x44b   :  { %v3994_v42 = vadd.f32 %v3993_v41, %v2697_v4 }
 0x44c   :  { %v3995_v7 = vpop.f32.mrf.mxu0  ;;  %v4038_v8 = vpop.f32.mrf.mxu1 }
 0x44d   :  { %v4037_v9 = vadd.f32 %v4036_v6, %v3994_v42  ;;  %v3996_v10 = vadd.f32 %v3995_v7, %v2701_v5 }
 0x44e   :  { %v3997_v11 = vpop.f32.mrf.mxu0  ;;  %v4040_v14 = vpop.f32.mrf.mxu1 }
 0x44f   :  { %v4215_v15 = vmul.f32 0.5, %v4037_v9  ;;  %v4039_v16 = vadd.f32 %v4038_v8, %v3996_v10  ;;  %v3998_v19 = vadd.f32 %v3997_v11, %v2697_v4 }
 0x450   :  { %v3999_v20 = vpop.f32.mrf.mxu0  ;;  %v4042_v25 = vpop.f32.mrf.mxu1 }
 0x451   :  { %5679 = vtanh.f32 %v4215_v15  ;;  %v4216_v22 = vmul.f32 0.5, %v4039_v16  ;;  %v4041_v24 = vadd.f32 %v4040_v14, %v3998_v19  ;;  %v4000_v18 = vadd.f32 %v3999_v20, %v2701_v5 }
 0x452   :  { %v2712_v15 = vsub.s32 6, %v6614_v54 }
 0x453   :  { %5681 = vtanh.f32 %v4216_v22  ;;  %v4222_v17 = vmul.f32 0.5, %v4041_v24  ;;  %v4043_v27 = vadd.f32 %v4042_v25, %v4000_v18 }
 0x454   :  { %v2713_v22 = vrot.slane %v7462_v33, %v2712_v15 }
 0x455   :  { %5683 = vtanh.f32 %v4222_v17  ;;  %v4223_v28 = vmul.f32 0.5, %v4043_v27 }
 0x457   :  { %5685 = vtanh.f32 %v4223_v28 }
 0x45e   :  { %v5680_v29 = vpop.eup %5679 }
 0x45f   :  { %v4243_v30 = vmul.f32 0.5, %v5680_v29 }
 0x460   :  { %v5682_v31 = vpop.eup %5681 }
 0x461   :  { %v4244_v32 = vmul.f32 0.5, %v5682_v31  ;;  %v4257_v35 = vadd.f32 0.5, %v4243_v30 }
 0x462   :  { %v5684_v34 = vpop.eup %5683 }
 0x463   :  { %v4258_v36 = vadd.f32 0.5, %v4244_v32  ;;  %v4250_v37 = vmul.f32 0.5, %v5684_v34 }
 0x464   :  { %v5686_v13 = vpop.eup %5685 }
 0x465   :  { %v4857_v38 = vpack.c.bf16 %v4258_v36, %v4257_v35  ;;  %v4251_v23 = vmul.f32 0.5, %v5686_v13  ;;  %v4264_v40 = vadd.f32 0.5, %v4250_v37 }
 0x467   :  { %4314 = vst [vmem:[%s7513_s10 + $0x8] sm:$0xff] %v4857_v38  ;;  %v4265_v12 = vadd.f32 0.5, %v4251_v23 }
 0x469   :  { %v4861_v43 = vpack.c.bf16 %v4265_v12, %v4264_v40 }
 0x46b   :  { %4319 = vst [vmem:[%s7513_s10 + $0x24] sm:$0xff] %v4861_v43 }
 0x48a   :  { %v4079_v48 = vpop.f32.mrf.mxu0 }
 0x48b   :  { %v4080_v49 = vadd.f32 %v4079_v48, %v2705_v46  ;;  %v4122_v50 = vpop.f32.mrf.mxu1 }
 0x48c   :  { %v4081_v39 = vpop.f32.mrf.mxu0 }
 0x48d   :  { %v4123_v51 = vadd.f32 %v4122_v50, %v4080_v49  ;;  %v4082_v26 = vadd.f32 %v4081_v39, %v2709_v47  ;;  %v4124_v52 = vpop.f32.mrf.mxu1 }
 0x48e   :  { %v4083_v53 = vpop.f32.mrf.mxu0 }
 0x48f   :  { %v4217_v55 = vmul.f32 0.5, %v4123_v51  ;;  %v4125_v56 = vadd.f32 %v4124_v52, %v4082_v26  ;;  %v4084_v57 = vadd.f32 %v4083_v53, %v2705_v46  ;;  %v4126_v58 = vpop.f32.mrf.mxu1 }
 0x490   :  { %v4085_v59 = vpop.f32.mrf.mxu0 }
 0x491   :  { %5687 = vtanh.f32 %v4217_v55  ;;  %v4218_v60 = vmul.f32 0.5, %v4125_v56  ;;  %v4127_v61 = vadd.f32 %v4126_v58, %v4084_v57  ;;  %v4086_v62 = vadd.f32 %v4085_v59, %v2709_v47  ;;  %v4128_v21 = vpop.f32.mrf.mxu1 }
 0x493   :  { %5689 = vtanh.f32 %v4218_v60  ;;  %v4224_v63 = vmul.f32 0.5, %v4127_v61  ;;  %v4129_v0 = vadd.f32 %v4128_v21, %v4086_v62 }
 0x495   :  { %5691 = vtanh.f32 %v4224_v63  ;;  %v4225_v1 = vmul.f32 0.5, %v4129_v0 }
 0x497   :  { %5693 = vtanh.f32 %v4225_v1 }
 0x49e   :  { %v5688_v2 = vpop.eup %5687 }
 0x49f   :  { %v4245_v3 = vmul.f32 0.5, %v5688_v2 }
 0x4a0   :  { %v5690_v4 = vpop.eup %5689 }
 0x4a1   :  { %v4246_v5 = vmul.f32 0.5, %v5690_v4  ;;  %v4259_v6 = vadd.f32 0.5, %v4245_v3 }
 0x4a2   :  { %v5692_v41 = vpop.eup %5691 }
 0x4a3   :  { %v4260_v42 = vadd.f32 0.5, %v4246_v5  ;;  %v4252_v7 = vmul.f32 0.5, %v5692_v41 }
 0x4a4   :  { %v5694_v8 = vpop.eup %5693 }
 0x4a5   :  { %v4858_v9 = vpack.c.bf16 %v4260_v42, %v4259_v6  ;;  %v4253_v10 = vmul.f32 0.5, %v5694_v8  ;;  %v4266_v11 = vadd.f32 0.5, %v4252_v7 }
 0x4a7   :  { %4315 = vst [vmem:[%s7513_s10 + $0x10] sm:$0xff] %v4858_v9  ;;  %v4267_v14 = vadd.f32 0.5, %v4253_v10 }
 0x4a9   :  { %v4862_v16 = vpack.c.bf16 %v4267_v14, %v4266_v11 }
 0x4aa   :  { %v4880_v19 = vpop.f32.mrf.mxu0 }
 0x4ab   :  { %4320 = vst [vmem:[%s7513_s10 + $0x2c] sm:$0xff] %v4862_v16  ;;  %v4902_v20 = vpop.f32.mrf.mxu1 }
 0x4ac   :  { %v4881_v24 = vpop.f32.mrf.mxu0 }
 0x4ad   :  { %v4882_v18 = vadd.f32 %v4881_v24, %v4880_v19  ;;  %v4903_v25 = vpop.f32.mrf.mxu1 }
 0x4ae   :  { %v4883_v17 = vpop.f32.mrf.mxu0  ;;  %v4904_v28 = vadd.f32 %v4903_v25, %v4902_v20 }
 0x4af   :  { %v4166_v27 = vadd.f32 %v4882_v18, %v2713_v22  ;;  %v4905_v29 = vpop.f32.mrf.mxu1 }
 0x4b0   :  { %v4884_v30 = vpop.f32.mrf.mxu0 }
 0x4b1   :  { %v4207_v31 = vadd.f32 %v4904_v28, %v4166_v27  ;;  %v4885_v32 = vadd.f32 %v4884_v30, %v4883_v17  ;;  %v4906_v54 = vpop.f32.mrf.mxu1 }
 0x4b2   :  { %v4907_v36 = vadd.f32 %v4906_v54, %v4905_v29 }
 0x4b3   :  { %v4219_v34 = vmul.f32 0.5, %v4207_v31  ;;  %v4169_v35 = vadd.f32 %v4885_v32, %v2713_v22 }
 0x4b5   :  { %5695 = vtanh.f32 %v4219_v34  ;;  %v4210_v37 = vadd.f32 %v4907_v36, %v4169_v35 }
 0x4b7   :  { %v4226_v13 = vmul.f32 0.5, %v4210_v37 }
 0x4b9   :  { %5697 = vtanh.f32 %v4226_v13 }
 0x4c2   :  { %v5696_v38 = vpop.eup %5695 }
 0x4c3   :  { %v4247_v33 = vmul.f32 0.5, %v5696_v38 }
 0x4c5   :  { %v4261_v23 = vadd.f32 0.5, %v4247_v33 }
 0x4c6   :  { %v5698_v40 = vpop.eup %5697 }
 0x4c7   :  { %v4859_v12 = vpack.c.bf16 %v4261_v23, %v4261_v23  ;;  %v4254_v43 = vmul.f32 0.5, %v5698_v40 }
 0x4c9   :  { %4317 = vst.msk [vmem:[%s7513_s10 + $0x18] sm:$0xf] %vm4316_vm1, %v4859_v12  ;;  %v4268_v45 = vadd.f32 0.5, %v4254_v43 }
 0x4cb   :  { %v4863_v44 = vpack.c.bf16 %v4268_v45, %v4268_v45 }
 0x4cd   :  { %4321 = vst.msk [vmem:[%s7513_s10 + $0x34] sm:$0xf] %vm4316_vm1, %v4863_v44 }

</bundles_post_ra>
